<compile_context>
chip_gen: v5e
topology: v5e:2x2
jax: 0.10.0
libtpu: 0.0.40
codegen_flags: <defaults>
</compile_context>

<pallas_src>
import functools
import jax
import jax.numpy as jnp
from jax import lax
from jax.experimental import pallas as pl
from jax.experimental.pallas import tpu as pltpu

NEG = -1e30      # "minus infinity" that stays NaN-safe under 0.0 * NEG
LN_EPS = 1e-12


def _round_up(x, m):
    return (x + m - 1) // m * m


# --------------------------------------------------------------------------------------
# Pallas kernel 1: fused LayerNorm + mid_linear (Linear+ReLU[+Dropout=id]) + classifier.
# Tiled over rows of the flattened [B*L, H] activation slab.
# --------------------------------------------------------------------------------------
def ner_head_kernel(x_ref, w1_ref, b1_ref, w2_ref, b2_ref, out_ref):
    x = x_ref[...].astype(jnp.float32)                          # [TM, H]  (LN math in f32)
    mu = jnp.mean(x, axis=-1, keepdims=True)
    xc = x - mu
    var = jnp.mean(xc * xc, axis=-1, keepdims=True)
    xn = xc * lax.rsqrt(var + LN_EPS)                           # LN weight=1, bias=0 (stub)
    h = jnp.dot(xn.astype(jnp.bfloat16), w1_ref[...],
                preferred_element_type=jnp.float32) + b1_ref[...]
    h = jnp.maximum(h, 0.0)                                     # ReLU (Dropout = identity)
    out_ref[...] = jnp.dot(h.astype(jnp.bfloat16), w2_ref[...],
                           preferred_element_type=jnp.float32) + b2_ref[...]


def ner_head(x_bf16, w1_bf16, b1, w2_bf16, b2, *, tm_cap=512):
    # tm_cap=512 keeps double-buffered x/out tiles + resident weights far below the 32 MiB
    # scoped VMEM default (and v7x's 64 MiB physical VMEM).
    BL, H = x_bf16.shape
    M = w1_bf16.shape[1]
    Kp = w2_bf16.shape[1]
    TM = min(tm_cap, _round_up(BL, 8))
    BL_pad = _round_up(BL, TM)
    if BL_pad != BL:
        x_bf16 = jnp.pad(x_bf16, ((0, BL_pad - BL), (0, 0)))
    out = pl.pallas_call(
        ner_head_kernel,
        out_shape=jax.ShapeDtypeStruct((BL_pad, Kp), jnp.float32),
        grid=(BL_pad // TM,),
        in_specs=[
            pl.BlockSpec((TM, H), lambda i: (i, 0)),
            pl.BlockSpec((H, M), lambda i: (0, 0)),     # weights: constant index -> resident
            pl.BlockSpec((1, M), lambda i: (0, 0)),
            pl.BlockSpec((M, Kp), lambda i: (0, 0)),
            pl.BlockSpec((1, Kp), lambda i: (0, 0)),
        ],
        out_specs=pl.BlockSpec((TM, Kp), lambda i: (i, 0)),
        compiler_params=pltpu.CompilerParams(dimension_semantics=("parallel",)),
    )(x_bf16, w1_bf16, b1, w2_bf16, b2)
    return out[:BL]


# --------------------------------------------------------------------------------------
# Pallas kernel 2: CRF — Viterbi decode (mask-less, as crf.decode(seq_out)) and the masked
# negative mean log-likelihood (-crf(seq_out, labels, mask, 'mean')).
# Refs are in [L, Bt, *] layout so the time loop uses cheap first-axis dynamic indexing.
# --------------------------------------------------------------------------------------
def crf_kernel(em_ref, lab_ref, mask_ref, start_ref, trans_ref, exp_trans_ref, end_ref,
               tags_ref, loss_ref, hist_ref):
    L, Bt, Kp = em_ref.shape
    start = start_ref[...]                                       # [1, Kp]
    trans = trans_ref[...]                                       # [Kp, Kp]
    exp_trans = exp_trans_ref[...]                               # [Kp, Kp], exp() hoisted
    end = end_ref[...]                                           # [1, Kp]

    # Hoisted loop-invariant iotas (not regenerated per timestep).
    iota_k = lax.broadcasted_iota(jnp.int32, (Bt, Kp), 1)
    iota_pk = lax.broadcasted_iota(jnp.int32, (Bt, Kp, Kp), 1)   # index of the "prev" axis

    em0 = em_ref[0]                                              # [Bt, Kp]
    oh0 = iota_k == lab_ref[0]                                   # one-hot of labels[:, 0]
    oh0_f = oh0.astype(jnp.float32)

    score0 = start + em0                                         # Viterbi (unmasked decode)
    alpha0 = start + em0                                         # forward algorithm
    # torchcrf assumes mask[:, 0] == 1 (left-contiguous mask), so t=0 terms are unmasked.
    num0 = jnp.sum(jnp.where(oh0, start + em0, 0.0), axis=1, keepdims=True)

    def step(t, carry):
        score, alpha, num, prev_oh, last_oh = carry
        em_t = em_ref[t]                                         # [Bt, Kp]
        m_t = mask_ref[t]                                        # [Bt, 1] f32
        oh_t = iota_k == lab_ref[t]
        oh_t_f = oh_t.astype(jnp.float32)

        # ---- Viterbi: emission is constant over the prev axis -> add after the max.
        # Tie-break = first (lowest) index, matching torch.max.
        nxt_v = score[:, :, None] + trans[None, :, :]            # [Bt, Kp(prev), Kp(cur)]
        best_val = jnp.max(nxt_v, axis=1)                        # [Bt, Kp]
        best_idx = jnp.min(
            jnp.where(nxt_v == best_val[:, None, :], iota_pk, Kp), axis=1)
        hist_ref[t] = best_idx
        score = best_val + em_t

        # ---- forward algorithm (log-sum-exp over all paths), masked update.
        # MXU reformulation:  lse[cur] = amax + log( (exp(alpha-amax) @ exp(trans))[cur] ) + em
        amax = jnp.max(alpha, axis=1, keepdims=True)             # [Bt, 1]   (always finite)
        ea = jnp.exp(alpha - amax)                               # [Bt, Kp]  in [0, 1]
        s = jnp.dot(ea, exp_trans, preferred_element_type=jnp.float32)   # tiny MXU op
        lse = jnp.log(s) + amax + em_t                           # padded lanes -> -inf (ok)
        alpha = jnp.where(m_t > 0.0, lse, alpha)                 # select: no 0*inf NaN risk

        # ---- gold-path numerator: trans[y_{t-1}, y_t] via a tiny MXU dot + one-hot reduce.
        trans_row = jnp.dot(prev_oh, trans, preferred_element_type=jnp.float32)
        trans_sc = jnp.sum(trans_row * oh_t_f, axis=1, keepdims=True)
        em_sc = jnp.sum(jnp.where(oh_t, em_t, 0.0), axis=1, keepdims=True)
        num = num + m_t * (trans_sc + em_sc)
        # prev_oh advances unconditionally (exactly torchcrf's tags[i-1] indexing; only valid
        # under its left-contiguous mask assumption).  last_oh tracks the last *masked* tag.
        last_oh = m_t * oh_t_f + (1.0 - m_t) * last_oh
        return score, alpha, num, oh_t_f, last_oh

    score, alpha, num, _, last_oh = lax.fori_loop(
        1, L, step, (score0, alpha0, num0, oh0_f, oh0_f))

    # ---- Viterbi termination + O(L) backtrack writing directly into the tags output.
    score = score + end
    mval = jnp.max(score, axis=1, keepdims=True)
    best = jnp.min(jnp.where(score == mval, iota_k, Kp), axis=1, keepdims=True)
    best = best.astype(jnp.int32)                                # [Bt, 1]
    tags_ref[L - 1] = best

    def back(s, cur):
        t = L - 2 - s
        hist = hist_ref[t + 1]                                   # best prev for step t+1
        sel = iota_k == cur
        cur = jnp.sum(jnp.where(sel, hist, 0), axis=1, keepdims=True).astype(jnp.int32)
        tags_ref[t] = cur
        return cur

    lax.fori_loop(0, L - 1, back, best)

    # ---- log-likelihood: numerator end term + denominator, partial sum -> SMEM scalar.
    num = num + jnp.sum(last_oh * end, axis=1, keepdims=True)    # end[y_last]
    alpha = alpha + end
    m2 = jnp.max(alpha, axis=1, keepdims=True)
    denom = jnp.log(jnp.sum(jnp.exp(alpha - m2), axis=1, keepdims=True)) + m2
    loss_ref[0, 0] = jnp.sum(num - denom)                        # sum of llh over this block


def crf_decode_and_loss(emissions, labels, mask, start, trans, end):
    # emissions: [B, L, Kp] f32 with padded label columns already ~ -1e30.
    B, L, Kp = emissions.shape
    Bt = 8 if B % 8 == 0 else B                                  # batch block (TPU sublane rule)
    nb = B // Bt

    em_t = jnp.transpose(emissions, (1, 0, 2))                   # [L, B, Kp]
    lab_t = jnp.transpose(labels.astype(jnp.int32))[:, :, None]  # [L, B, 1]
    mask_t = jnp.transpose(mask.astype(jnp.float32))[:, :, None]  # [L, B, 1]
    exp_trans = jnp.exp(trans)                                   # hoisted out of the kernel;
                                                                 # padded entries exp(NEG)=0

    tags_t, loss_parts = pl.pallas_call(
        crf_kernel,
        out_shape=(
            jax.ShapeDtypeStruct((L, B, 1), jnp.int32),
            jax.ShapeDtypeStruct((nb, 1), jnp.float32),
        ),
        grid=(nb,),
        in_specs=[
            pl.BlockSpec((L, Bt, Kp), lambda i: (0, i, 0)),
            pl.BlockSpec((L, Bt, 1), lambda i: (0, i, 0)),
            pl.BlockSpec((L, Bt, 1), lambda i: (0, i, 0)),
            pl.BlockSpec((1, Kp), lambda i: (0, 0)),
            pl.BlockSpec((Kp, Kp), lambda i: (0, 0)),
            pl.BlockSpec((Kp, Kp), lambda i: (0, 0)),
            pl.BlockSpec((1, Kp), lambda i: (0, 0)),
        ],
        out_specs=(
            pl.BlockSpec((L, Bt, 1), lambda i: (0, i, 0)),
            pl.BlockSpec((1, 1), lambda i: (i, 0), memory_space=pltpu.MemorySpace.SMEM),
        ),
        scratch_shapes=[pltpu.VMEM((L, Bt, Kp), jnp.int32)],     # Viterbi history
        compiler_params=pltpu.CompilerParams(dimension_semantics=("parallel",)),
    )(em_t, lab_t, mask_t, start, trans, exp_trans, end)

    tags = jnp.transpose(tags_t[:, :, 0])                        # [B, L] int32
    loss = -(jnp.sum(loss_parts) / B)                            # reduction='mean' over batch
    return tags, loss


# --------------------------------------------------------------------------------------
# Parameter construction (deterministic) and the base_model stand-in (plain JAX glue).
# --------------------------------------------------------------------------------------
def init_params(key, *, vocab, max_seq_len, hidden, mid, num_labels, initializer_range=0.02):
    ks = jax.random.split(key, 6)
    return {
        # base-model stand-in
        "emb": jax.random.normal(ks[0], (vocab, hidden), jnp.float32) * initializer_range,
        "pos": jax.random.normal(ks[1], (max_seq_len, hidden), jnp.float32) * initializer_range,
        # mid_linear: Linear(hidden -> mid); bias zero-init per _init_weights
        "w1": jax.random.normal(ks[2], (hidden, mid), jnp.float32) * initializer_range,
        "b1": jnp.zeros((1, mid), jnp.float32),
        # classifier: Linear(mid -> num_labels); bias zero-init per _init_weights
        "w2": jax.random.normal(ks[3], (mid, num_labels), jnp.float32) * initializer_range,
        "b2": jnp.zeros((1, num_labels), jnp.float32),
        # CRF params (torchcrf init: uniform(-0.1, 0.1))
        "crf_start": jax.random.uniform(ks[4], (1, num_labels), jnp.float32, -0.1, 0.1),
        "crf_end": jax.random.uniform(ks[5], (1, num_labels), jnp.float32, -0.1, 0.1),
        "crf_trans": jax.random.uniform(
            jax.random.fold_in(key, 7), (num_labels, num_labels), jnp.float32, -0.1, 0.1),
    }


@functools.partial(jax.jit, static_argnames=())
def transformer_ner_forward(params, input_ids, attention_mask, labels):
    B, L = input_ids.shape
    H = params["emb"].shape[1]
    K = params["w2"].shape[1]
    Kp = _round_up(max(K, 1), 128)                               # lane-dense label dimension

    # base_model stand-in: embedding + positional; its LayerNorm is fused into ner_head.
    h_raw = params["emb"][input_ids] + params["pos"][None, :L, :]          # [B, L, H] f32

    # Pad classifier / CRF params to Kp lanes; padded entries masked so they are never chosen.
    pad_k = Kp - K
    w2p = jnp.pad(params["w2"], ((0, 0), (0, pad_k)))                      # zeros
    b2p = jnp.pad(params["b2"], ((0, 0), (0, pad_k)), constant_values=NEG)
    startp = jnp.pad(params["crf_start"], ((0, 0), (0, pad_k)), constant_values=NEG)
    endp = jnp.pad(params["crf_end"], ((0, 0), (0, pad_k)), constant_values=NEG)
    transp = jnp.pad(params["crf_trans"], ((0, pad_k), (0, pad_k)), constant_values=NEG)

    x = h_raw.reshape(B * L, H).astype(jnp.bfloat16)
    emissions = ner_head(x, params["w1"].astype(jnp.bfloat16), params["b1"],
                         w2p.astype(jnp.bfloat16), b2p).reshape(B, L, Kp)

    tags, loss = crf_decode_and_loss(emissions, labels, attention_mask,
                                     startp, transp, endp)
    return {"logits": tags, "loss": loss}


if __name__ == "__main__":
    B, L, H, MID, K, VOCAB = 2, 8, 32, 128, 7, 50

    key = jax.random.PRNGKey(0)
    kp, ki, kl = jax.random.split(key, 3)
    params = init_params(kp, vocab=VOCAB, max_seq_len=L, hidden=H, mid=MID, num_labels=K)

    input_ids = jax.random.randint(ki, (B, L), 0, VOCAB, dtype=jnp.int32)
    attention_mask = jnp.array([[1] * L, [1] * (L - 2) + [0, 0]], dtype=jnp.int32)
    labels = jax.random.randint(kl, (B, L), 0, K, dtype=jnp.int32)

    out = transformer_ner_forward(params, input_ids, attention_mask, labels)
    jax.block_until_ready(out)

    assert out["logits"].shape == (B, L) and out["logits"].dtype == jnp.int32
    assert out["loss"].shape == ()
    assert bool(jnp.isfinite(out["loss"]))
    assert 0 <= int(jnp.min(out["logits"])) and int(jnp.max(out["logits"])) < K
    print("KERNEL_OK")
</pallas_src>

<mosaic_0001>
module attributes {stable_mosaic.version = 11 : i64} {
  func.func @ner_head_kernel(%arg0: i32, %arg1: memref<16x32xbf16, #tpu.memory_space<vmem>>, %arg2: memref<32x128xbf16, #tpu.memory_space<vmem>>, %arg3: memref<1x128xf32, #tpu.memory_space<vmem>>, %arg4: memref<128x128xbf16, #tpu.memory_space<vmem>>, %arg5: memref<1x128xf32, #tpu.memory_space<vmem>>, %arg6: memref<16x128xf32, #tpu.memory_space<vmem>>) attributes {dimension_semantics = [#tpu.dimension_semantics<parallel>], iteration_bounds = array<i64: 1>, scalar_prefetch = 0 : i64, scratch_operands = 0 : i64, tpu.core_type = #tpu.core_type<tc>, window_params = [{transform_indices = @transform_0, window_bounds = array<i64: 16, 32>}, {pipeline_mode = #tpu.pipeline_mode<synchronous>, transform_indices = @transform_1, window_bounds = array<i64: 32, 128>}, {pipeline_mode = #tpu.pipeline_mode<synchronous>, transform_indices = @transform_2, window_bounds = array<i64: 1, 128>}, {pipeline_mode = #tpu.pipeline_mode<synchronous>, transform_indices = @transform_3, window_bounds = array<i64: 128, 128>}, {pipeline_mode = #tpu.pipeline_mode<synchronous>, transform_indices = @transform_4, window_bounds = array<i64: 1, 128>}, {transform_indices = @transform_5, window_bounds = array<i64: 16, 128>}]} {
    %c0 = arith.constant 0 : index
    %c0_0 = arith.constant 0 : index
    %0 = vector.load %arg1[%c0, %c0_0] : memref<16x32xbf16, #tpu.memory_space<vmem>>, vector<16x32xbf16>
    %1 = arith.extf %0 : vector<16x32xbf16> to vector<16x32xf32>
    %cst = arith.constant dense<0.000000e+00> : vector<16xf32>
    %2 = vector.multi_reduction <add>, %1, %cst [1] : vector<16x32xf32> to vector<16xf32>
    %3 = vector.shape_cast %2 : vector<16xf32> to vector<16x1xf32>
    %cst_1 = arith.constant 3.200000e+01 : f32
    %4 = vector.broadcast %cst_1 : f32 to vector<16x1xf32>
    %5 = arith.divf %3, %4 : vector<16x1xf32>
    %6 = vector.broadcast %5 : vector<16x1xf32> to vector<16x32xf32>
    %7 = arith.subf %1, %6 : vector<16x32xf32>
    %8 = arith.mulf %7, %7 : vector<16x32xf32>
    %cst_2 = arith.constant dense<0.000000e+00> : vector<16xf32>
    %9 = vector.multi_reduction <add>, %8, %cst_2 [1] : vector<16x32xf32> to vector<16xf32>
    %10 = vector.shape_cast %9 : vector<16xf32> to vector<16x1xf32>
    %cst_3 = arith.constant 3.200000e+01 : f32
    %11 = vector.broadcast %cst_3 : f32 to vector<16x1xf32>
    %12 = arith.divf %10, %11 : vector<16x1xf32>
    %cst_4 = arith.constant 9.99999996E-13 : f32
    %13 = vector.broadcast %cst_4 : f32 to vector<16x1xf32>
    %14 = arith.addf %12, %13 : vector<16x1xf32>
    %15 = math.rsqrt %14 : vector<16x1xf32>
    %16 = vector.broadcast %15 : vector<16x1xf32> to vector<16x32xf32>
    %17 = arith.mulf %7, %16 : vector<16x32xf32>
    %18 = arith.truncf %17 : vector<16x32xf32> to vector<16x32xbf16>
    %c0_5 = arith.constant 0 : index
    %c0_6 = arith.constant 0 : index
    %19 = vector.load %arg2[%c0_5, %c0_6] : memref<32x128xbf16, #tpu.memory_space<vmem>>, vector<32x128xbf16>
    %cst_7 = arith.constant dense<0.000000e+00> : vector<16x128xf32>
    %20 = tpu.matmul %18, %19, %cst_7 {dimension_numbers = #tpu.dot_dimension_numbers<[1], [0], [0], [1], [0, 0, 1, 1], [], []>} : vector<16x32xbf16>, vector<32x128xbf16>, vector<16x128xf32> -> vector<16x128xf32>
    %c0_8 = arith.constant 0 : index
    %c0_9 = arith.constant 0 : index
    %21 = vector.load %arg3[%c0_8, %c0_9] : memref<1x128xf32, #tpu.memory_space<vmem>>, vector<1x128xf32>
    %22 = vector.broadcast %21 : vector<1x128xf32> to vector<16x128xf32>
    %23 = arith.addf %20, %22 : vector<16x128xf32>
    %cst_10 = arith.constant 0.000000e+00 : f32
    %24 = vector.broadcast %cst_10 : f32 to vector<16x128xf32>
    %25 = arith.maximumf %23, %24 : vector<16x128xf32>
    %26 = arith.truncf %25 : vector<16x128xf32> to vector<16x128xbf16>
    %c0_11 = arith.constant 0 : index
    %c0_12 = arith.constant 0 : index
    %27 = vector.load %arg4[%c0_11, %c0_12] : memref<128x128xbf16, #tpu.memory_space<vmem>>, vector<128x128xbf16>
    %cst_13 = arith.constant dense<0.000000e+00> : vector<16x128xf32>
    %28 = tpu.matmul %26, %27, %cst_13 {dimension_numbers = #tpu.dot_dimension_numbers<[1], [0], [0], [1], [0, 0, 1, 1], [], []>} : vector<16x128xbf16>, vector<128x128xbf16>, vector<16x128xf32> -> vector<16x128xf32>
    %c0_14 = arith.constant 0 : index
    %c0_15 = arith.constant 0 : index
    %29 = vector.load %arg5[%c0_14, %c0_15] : memref<1x128xf32, #tpu.memory_space<vmem>>, vector<1x128xf32>
    %30 = vector.broadcast %29 : vector<1x128xf32> to vector<16x128xf32>
    %31 = arith.addf %28, %30 : vector<16x128xf32>
    %c0_16 = arith.constant 0 : index
    %c0_17 = arith.constant 0 : index
    %32 = vector.load %arg6[%c0_16, %c0_17] : memref<16x128xf32, #tpu.memory_space<vmem>>, vector<16x128xf32>
    tpu.vector_store %arg6[%c0_16, %c0_17], %31 {strides = array<i32>} : memref<16x128xf32, #tpu.memory_space<vmem>>, vector<16x128xf32>,
    return
  }
  func.func @transform_0(%arg0: i32) -> (i32, i32) {
    %c0_i32 = arith.constant 0 : i32
    %c0_i32_0 = arith.constant 0 : i32
    return %arg0, %c0_i32 : i32, i32
  }
  func.func @transform_1(%arg0: i32) -> (i32, i32) {
    %c0_i32 = arith.constant 0 : i32
    %c0_i32_0 = arith.constant 0 : i32
    %c0_i32_1 = arith.constant 0 : i32
    return %c0_i32, %c0_i32_0 : i32, i32
  }
  func.func @transform_2(%arg0: i32) -> (i32, i32) {
    %c0_i32 = arith.constant 0 : i32
    %c0_i32_0 = arith.constant 0 : i32
    %c0_i32_1 = arith.constant 0 : i32
    return %c0_i32, %c0_i32_0 : i32, i32
  }
  func.func @transform_3(%arg0: i32) -> (i32, i32) {
    %c0_i32 = arith.constant 0 : i32
    %c0_i32_0 = arith.constant 0 : i32
    %c0_i32_1 = arith.constant 0 : i32
    return %c0_i32, %c0_i32_0 : i32, i32
  }
  func.func @transform_4(%arg0: i32) -> (i32, i32) {
    %c0_i32 = arith.constant 0 : i32
    %c0_i32_0 = arith.constant 0 : i32
    %c0_i32_1 = arith.constant 0 : i32
    return %c0_i32, %c0_i32_0 : i32, i32
  }
  func.func @transform_5(%arg0: i32) -> (i32, i32) {
    %c0_i32 = arith.constant 0 : i32
    %c0_i32_0 = arith.constant 0 : i32
    return %arg0, %c0_i32 : i32, i32
  }
}

module attributes {stable_mosaic.version = 11 : i64} {
  func.func @crf_kernel(%arg0: i32, %arg1: memref<8x2x128xf32, #tpu.memory_space<vmem>>, %arg2: memref<8x2x1xi32, #tpu.memory_space<vmem>>, %arg3: memref<8x2x1xf32, #tpu.memory_space<vmem>>, %arg4: memref<1x128xf32, #tpu.memory_space<vmem>>, %arg5: memref<128x128xf32, #tpu.memory_space<vmem>>, %arg6: memref<128x128xf32, #tpu.memory_space<vmem>>, %arg7: memref<1x128xf32, #tpu.memory_space<vmem>>, %arg8: memref<8x2x1xi32, #tpu.memory_space<vmem>>, %arg9: memref<1x1xf32, #tpu.memory_space<smem>>, %arg10: memref<8x2x128xi32, #tpu.memory_space<vmem>>) attributes {dimension_semantics = [#tpu.dimension_semantics<parallel>], iteration_bounds = array<i64: 1>, scalar_prefetch = 0 : i64, scratch_operands = 1 : i64, tpu.core_type = #tpu.core_type<tc>, window_params = [{transform_indices = @transform_0, window_bounds = array<i64: 8, 2, 128>}, {transform_indices = @transform_1, window_bounds = array<i64: 8, 2, 1>}, {transform_indices = @transform_2, window_bounds = array<i64: 8, 2, 1>}, {pipeline_mode = #tpu.pipeline_mode<synchronous>, transform_indices = @transform_3, window_bounds = array<i64: 1, 128>}, {pipeline_mode = #tpu.pipeline_mode<synchronous>, transform_indices = @transform_4, window_bounds = array<i64: 128, 128>}, {pipeline_mode = #tpu.pipeline_mode<synchronous>, transform_indices = @transform_5, window_bounds = array<i64: 128, 128>}, {pipeline_mode = #tpu.pipeline_mode<synchronous>, transform_indices = @transform_6, window_bounds = array<i64: 1, 128>}, {transform_indices = @transform_7, window_bounds = array<i64: 8, 2, 1>}, {transform_indices = @transform_8, window_bounds = array<i64: 1, 1>}]} {
    %c0 = arith.constant 0 : index
    %c0_0 = arith.constant 0 : index
    %0 = vector.load %arg4[%c0, %c0_0] : memref<1x128xf32, #tpu.memory_space<vmem>>, vector<1x128xf32>
    %c0_1 = arith.constant 0 : index
    %c0_2 = arith.constant 0 : index
    %1 = vector.load %arg5[%c0_1, %c0_2] : memref<128x128xf32, #tpu.memory_space<vmem>>, vector<128x128xf32>
    %c0_3 = arith.constant 0 : index
    %c0_4 = arith.constant 0 : index
    %2 = vector.load %arg6[%c0_3, %c0_4] : memref<128x128xf32, #tpu.memory_space<vmem>>, vector<128x128xf32>
    %c0_5 = arith.constant 0 : index
    %c0_6 = arith.constant 0 : index
    %3 = vector.load %arg7[%c0_5, %c0_6] : memref<1x128xf32, #tpu.memory_space<vmem>>, vector<1x128xf32>
    %4 = tpu.iota {dimensions = array<i32: 1>} : vector<2x128xi32>
    %5 = tpu.iota {dimensions = array<i32: 1>} : vector<2x128x128xi32>
    %c0_7 = arith.constant 0 : index
    %c0_8 = arith.constant 0 : index
    %c0_9 = arith.constant 0 : index
    %6 = vector.load %arg1[%c0_7, %c0_8, %c0_9] : memref<8x2x128xf32, #tpu.memory_space<vmem>>, vector<1x2x128xf32>
    %7 = vector.shape_cast %6 : vector<1x2x128xf32> to vector<2x128xf32>
    %c0_10 = arith.constant 0 : index
    %c0_11 = arith.constant 0 : index
    %c0_12 = arith.constant 0 : index
    %8 = vector.load %arg2[%c0_10, %c0_11, %c0_12] : memref<8x2x1xi32, #tpu.memory_space<vmem>>, vector<1x2x1xi32>
    %9 = vector.shape_cast %8 : vector<1x2x1xi32> to vector<2x1xi32>
    %10 = vector.broadcast %9 : vector<2x1xi32> to vector<2x128xi32>
    %11 = arith.cmpi eq, %4, %10 : vector<2x128xi32>
    %12 = arith.extui %11 : vector<2x128xi1> to vector<2x128xi32>
    %13 = arith.sitofp %12 : vector<2x128xi32> to vector<2x128xf32>
    %14 = vector.broadcast %0 : vector<1x128xf32> to vector<2x128xf32>
    %15 = arith.addf %14, %7 : vector<2x128xf32>
    %16 = vector.broadcast %0 : vector<1x128xf32> to vector<2x128xf32>
    %17 = arith.addf %16, %7 : vector<2x128xf32>
    %18 = vector.broadcast %0 : vector<1x128xf32> to vector<2x128xf32>
    %19 = arith.addf %18, %7 : vector<2x128xf32>
    %cst = arith.constant 0.000000e+00 : f32
    %20 = vector.broadcast %cst : f32 to vector<2x128xf32>
    %21 = arith.select %11, %19, %20 : vector<2x128xi1>, vector<2x128xf32>
    %cst_13 = arith.constant dense<0.000000e+00> : vector<2xf32>
    %22 = vector.multi_reduction <add>, %21, %cst_13 [1] : vector<2x128xf32> to vector<2xf32>
    %23 = vector.shape_cast %22 : vector<2xf32> to vector<2x1xf32>
    %c1_i32 = arith.constant 1 : i32
    %c7_i32 = arith.constant 7 : i32
    %24 = arith.addi %c1_i32, %c7_i32 : i32
    %c1_i32_14 = arith.constant 1 : i32
    %25:5 = scf.for %arg11 = %c1_i32 to %24 step %c1_i32_14 iter_args(%arg12 = %15, %arg13 = %17, %arg14 = %23, %arg15 = %13, %arg16 = %13) -> (vector<2x128xf32>, vector<2x128xf32>, vector<2x1xf32>, vector<2x128xf32>, vector<2x128xf32>)  : i32 {
      %63 = arith.index_cast %arg11 : i32 to index
      %c0_29 = arith.constant 0 : index
      %c0_30 = arith.constant 0 : index
      %64 = vector.load %arg1[%63, %c0_29, %c0_30] : memref<8x2x128xf32, #tpu.memory_space<vmem>>, vector<1x2x128xf32>
      %65 = vector.shape_cast %64 : vector<1x2x128xf32> to vector<2x128xf32>
      %66 = arith.index_cast %arg11 : i32 to index
      %c0_31 = arith.constant 0 : index
      %c0_32 = arith.constant 0 : index
      %67 = vector.load %arg3[%66, %c0_31, %c0_32] : memref<8x2x1xf32, #tpu.memory_space<vmem>>, vector<1x2x1xf32>
      %68 = vector.shape_cast %67 : vector<1x2x1xf32> to vector<2x1xf32>
      %69 = arith.index_cast %arg11 : i32 to index
      %c0_33 = arith.constant 0 : index
      %c0_34 = arith.constant 0 : index
      %70 = vector.load %arg2[%69, %c0_33, %c0_34] : memref<8x2x1xi32, #tpu.memory_space<vmem>>, vector<1x2x1xi32>
      %71 = vector.shape_cast %70 : vector<1x2x1xi32> to vector<2x1xi32>
      %72 = vector.broadcast %71 : vector<2x1xi32> to vector<2x128xi32>
      %73 = arith.cmpi eq, %4, %72 : vector<2x128xi32>
      %74 = arith.extui %73 : vector<2x128xi1> to vector<2x128xi32>
      %75 = arith.sitofp %74 : vector<2x128xi32> to vector<2x128xf32>
      %76 = vector.shape_cast %arg12 : vector<2x128xf32> to vector<2x128x1xf32>
      %77 = vector.shape_cast %1 : vector<128x128xf32> to vector<1x128x128xf32>
      %78 = vector.broadcast %76 : vector<2x128x1xf32> to vector<2x128x128xf32>
      %79 = vector.broadcast %77 : vector<1x128x128xf32> to vector<2x128x128xf32>
      %80 = arith.addf %78, %79 : vector<2x128x128xf32>
      %cst_35 = arith.constant dense<0xFF800000> : vector<2x128xf32>
      %81 = vector.multi_reduction <maximumf>, %80, %cst_35 [1] : vector<2x128x128xf32> to vector<2x128xf32>
      %82 = vector.shape_cast %81 : vector<2x128xf32> to vector<2x1x128xf32>
      %83 = vector.broadcast %82 : vector<2x1x128xf32> to vector<2x128x128xf32>
      %84 = arith.cmpf oeq, %80, %83 : vector<2x128x128xf32>
      %c128_i32_36 = arith.constant 128 : i32
      %85 = vector.broadcast %c128_i32_36 : i32 to vector<2x128x128xi32>
      %86 = arith.select %84, %5, %85 : vector<2x128x128xi1>, vector<2x128x128xi32>
      %cst_37 = arith.constant dense<2147483647> : vector<2x128xi32>
      %87 = vector.multi_reduction <minsi>, %86, %cst_37 [1] : vector<2x128x128xi32> to vector<2x128xi32>
      %88 = arith.index_cast %arg11 : i32 to index
      %c0_38 = arith.constant 0 : index
      %c0_39 = arith.constant 0 : index
      %89 = vector.load %arg10[%88, %c0_38, %c0_39] : memref<8x2x128xi32, #tpu.memory_space<vmem>>, vector<1x2x128xi32>
      %90 = vector.shape_cast %89 : vector<1x2x128xi32> to vector<2x128xi32>
      %91 = vector.shape_cast %87 : vector<2x128xi32> to vector<1x2x128xi32>
      tpu.vector_store %arg10[%88, %c0_38, %c0_39], %91 {strides = array<i32>} : memref<8x2x128xi32, #tpu.memory_space<vmem>>, vector<1x2x128xi32>,
      %92 = arith.addf %81, %65 : vector<2x128xf32>
      %cst_40 = arith.constant dense<0xFF800000> : vector<2xf32>
      %93 = vector.multi_reduction <maximumf>, %arg13, %cst_40 [1] : vector<2x128xf32> to vector<2xf32>
      %94 = vector.shape_cast %93 : vector<2xf32> to vector<2x1xf32>
      %95 = vector.broadcast %94 : vector<2x1xf32> to vector<2x128xf32>
      %96 = arith.subf %arg13, %95 : vector<2x128xf32>
      %97 = math.exp %96 : vector<2x128xf32>
      %cst_41 = arith.constant dense<0.000000e+00> : vector<2x128xf32>
      %98 = tpu.matmul %97, %2, %cst_41 {dimension_numbers = #tpu.dot_dimension_numbers<[1], [0], [0], [1], [0, 0, 1, 1], [], []>} : vector<2x128xf32>, vector<128x128xf32>, vector<2x128xf32> -> vector<2x128xf32>
      %99 = math.log %98 : vector<2x128xf32>
      %100 = vector.broadcast %94 : vector<2x1xf32> to vector<2x128xf32>
      %101 = arith.addf %99, %100 : vector<2x128xf32>
      %102 = arith.addf %101, %65 : vector<2x128xf32>
      %cst_42 = arith.constant 0.000000e+00 : f32
      %103 = vector.broadcast %cst_42 : f32 to vector<2x1xf32>
      %104 = arith.cmpf ogt, %68, %103 : vector<2x1xf32>
      %105 = vector.shape_cast %104 : vector<2x1xi1> to vector<2x1xi1>
      %106 = vector.broadcast %105 : vector<2x1xi1> to vector<2x128xi1>
      %107 = arith.select %106, %102, %arg13 : vector<2x128xi1>, vector<2x128xf32>
      %cst_43 = arith.constant dense<0.000000e+00> : vector<2x128xf32>
      %108 = tpu.matmul %arg15, %1, %cst_43 {dimension_numbers = #tpu.dot_dimension_numbers<[1], [0], [0], [1], [0, 0, 1, 1], [], []>} : vector<2x128xf32>, vector<128x128xf32>, vector<2x128xf32> -> vector<2x128xf32>
      %109 = arith.mulf %108, %75 : vector<2x128xf32>
      %cst_44 = arith.constant dense<0.000000e+00> : vector<2xf32>
      %110 = vector.multi_reduction <add>, %109, %cst_44 [1] : vector<2x128xf32> to vector<2xf32>
      %111 = vector.shape_cast %110 : vector<2xf32> to vector<2x1xf32>
      %cst_45 = arith.constant 0.000000e+00 : f32
      %112 = vector.broadcast %cst_45 : f32 to vector<2x128xf32>
      %113 = arith.select %73, %65, %112 : vector<2x128xi1>, vector<2x128xf32>
      %cst_46 = arith.constant dense<0.000000e+00> : vector<2xf32>
      %114 = vector.multi_reduction <add>, %113, %cst_46 [1] : vector<2x128xf32> to vector<2xf32>
      %115 = vector.shape_cast %114 : vector<2xf32> to vector<2x1xf32>
      %116 = arith.addf %111, %115 : vector<2x1xf32>
      %117 = arith.mulf %68, %116 : vector<2x1xf32>
      %118 = arith.addf %arg14, %117 : vector<2x1xf32>
      %119 = vector.broadcast %68 : vector<2x1xf32> to vector<2x128xf32>
      %120 = arith.mulf %119, %75 : vector<2x128xf32>
      %cst_47 = arith.constant 1.000000e+00 : f32
      %121 = vector.broadcast %cst_47 : f32 to vector<2x1xf32>
      %122 = arith.subf %121, %68 : vector<2x1xf32>
      %123 = vector.broadcast %122 : vector<2x1xf32> to vector<2x128xf32>
      %124 = arith.mulf %123, %arg16 : vector<2x128xf32>
      %125 = arith.addf %120, %124 : vector<2x128xf32>
      scf.yield %92, %107, %118, %75, %125 : vector<2x128xf32>, vector<2x128xf32>, vector<2x1xf32>, vector<2x128xf32>, vector<2x128xf32>
    }
    %c7_i32_15 = arith.constant 7 : i32
    %26 = vector.broadcast %3 : vector<1x128xf32> to vector<2x128xf32>
    %27 = arith.addf %25#0, %26 : vector<2x128xf32>
    %cst_16 = arith.constant dense<0xFF800000> : vector<2xf32>
    %28 = vector.multi_reduction <maximumf>, %27, %cst_16 [1] : vector<2x128xf32> to vector<2xf32>
    %29 = vector.shape_cast %28 : vector<2xf32> to vector<2x1xf32>
    %30 = vector.broadcast %29 : vector<2x1xf32> to vector<2x128xf32>
    %31 = arith.cmpf oeq, %27, %30 : vector<2x128xf32>
    %c128_i32 = arith.constant 128 : i32
    %32 = vector.broadcast %c128_i32 : i32 to vector<2x128xi32>
    %33 = arith.select %31, %4, %32 : vector<2x128xi1>, vector<2x128xi32>
    %cst_17 = arith.constant dense<2147483647> : vector<2xi32>
    %34 = vector.multi_reduction <minsi>, %33, %cst_17 [1] : vector<2x128xi32> to vector<2xi32>
    %35 = vector.shape_cast %34 : vector<2xi32> to vector<2x1xi32>
    %c7 = arith.constant 7 : index
    %c0_18 = arith.constant 0 : index
    %c0_19 = arith.constant 0 : index
    %36 = vector.load %arg8[%c7, %c0_18, %c0_19] : memref<8x2x1xi32, #tpu.memory_space<vmem>>, vector<1x2x1xi32>
    %37 = vector.shape_cast %36 : vector<1x2x1xi32> to vector<2x1xi32>
    %38 = vector.shape_cast %35 : vector<2x1xi32> to vector<1x2x1xi32>
    tpu.vector_store %arg8[%c7, %c0_18, %c0_19], %38 {strides = array<i32>} : memref<8x2x1xi32, #tpu.memory_space<vmem>>, vector<1x2x1xi32>,
    %c0_i32 = arith.constant 0 : i32
    %c7_i32_20 = arith.constant 7 : i32
    %39 = arith.addi %c0_i32, %c7_i32_20 : i32
    %c1_i32_21 = arith.constant 1 : i32
    %40 = scf.for %arg11 = %c0_i32 to %39 step %c1_i32_21 iter_args(%arg12 = %35) -> (vector<2x1xi32>)  : i32 {
      %c6_i32 = arith.constant 6 : i32
      %63 = arith.subi %c6_i32, %arg11 : i32
      %c1_i32_29 = arith.constant 1 : i32
      %64 = arith.addi %63, %c1_i32_29 : i32
      %65 = arith.index_cast %64 : i32 to index
      %c0_30 = arith.constant 0 : index
      %c0_31 = arith.constant 0 : index
      %66 = vector.load %arg10[%65, %c0_30, %c0_31] : memref<8x2x128xi32, #tpu.memory_space<vmem>>, vector<1x2x128xi32>
      %67 = vector.shape_cast %66 : vector<1x2x128xi32> to vector<2x128xi32>
      %68 = vector.broadcast %arg12 : vector<2x1xi32> to vector<2x128xi32>
      %69 = arith.cmpi eq, %4, %68 : vector<2x128xi32>
      %c0_i32_32 = arith.constant 0 : i32
      %70 = vector.broadcast %c0_i32_32 : i32 to vector<2x128xi32>
      %71 = arith.select %69, %67, %70 : vector<2x128xi1>, vector<2x128xi32>
      %cst_33 = arith.constant dense<0> : vector<2xi32>
      %72 = vector.multi_reduction <add>, %71, %cst_33 [1] : vector<2x128xi32> to vector<2xi32>
      %73 = vector.shape_cast %72 : vector<2xi32> to vector<2x1xi32>
      %74 = arith.index_cast %63 : i32 to index
      %c0_34 = arith.constant 0 : index
      %c0_35 = arith.constant 0 : index
      %75 = vector.load %arg8[%74, %c0_34, %c0_35] : memref<8x2x1xi32, #tpu.memory_space<vmem>>, vector<1x2x1xi32>
      %76 = vector.shape_cast %75 : vector<1x2x1xi32> to vector<2x1xi32>
      %77 = vector.shape_cast %73 : vector<2x1xi32> to vector<1x2x1xi32>
      tpu.vector_store %arg8[%74, %c0_34, %c0_35], %77 {strides = array<i32>} : memref<8x2x1xi32, #tpu.memory_space<vmem>>, vector<1x2x1xi32>,
      scf.yield %73 : vector<2x1xi32>
    }
    %c7_i32_22 = arith.constant 7 : i32
    %41 = vector.broadcast %3 : vector<1x128xf32> to vector<2x128xf32>
    %42 = arith.mulf %25#4, %41 : vector<2x128xf32>
    %cst_23 = arith.constant dense<0.000000e+00> : vector<2xf32>
    %43 = vector.multi_reduction <add>, %42, %cst_23 [1] : vector<2x128xf32> to vector<2xf32>
    %44 = vector.shape_cast %43 : vector<2xf32> to vector<2x1xf32>
    %45 = arith.addf %25#2, %44 : vector<2x1xf32>
    %46 = vector.broadcast %3 : vector<1x128xf32> to vector<2x128xf32>
    %47 = arith.addf %25#1, %46 : vector<2x128xf32>
    %cst_24 = arith.constant dense<0xFF800000> : vector<2xf32>
    %48 = vector.multi_reduction <maximumf>, %47, %cst_24 [1] : vector<2x128xf32> to vector<2xf32>
    %49 = vector.shape_cast %48 : vector<2xf32> to vector<2x1xf32>
    %50 = vector.broadcast %49 : vector<2x1xf32> to vector<2x128xf32>
    %51 = arith.subf %47, %50 : vector<2x128xf32>
    %52 = math.exp %51 : vector<2x128xf32>
    %cst_25 = arith.constant dense<0.000000e+00> : vector<2xf32>
    %53 = vector.multi_reduction <add>, %52, %cst_25 [1] : vector<2x128xf32> to vector<2xf32>
    %54 = vector.shape_cast %53 : vector<2xf32> to vector<2x1xf32>
    %55 = math.log %54 : vector<2x1xf32>
    %56 = arith.addf %55, %49 : vector<2x1xf32>
    %57 = arith.subf %45, %56 : vector<2x1xf32>
    %58 = vector.shape_cast %57 : vector<2x1xf32> to vector<1x2x1xf32>
    %cst_26 = arith.constant dense<0.000000e+00> : vector<1xf32>
    %59 = vector.multi_reduction <add>, %58, %cst_26 [1, 2] : vector<1x2x1xf32> to vector<1xf32>
    %60 = vector.shape_cast %59 : vector<1xf32> to vector<1x1x1xf32>
    %61 = vector.extract %60[0, 0, 0] : f32 from vector<1x1x1xf32>
    %c0_27 = arith.constant 0 : index
    %c0_28 = arith.constant 0 : index
    %62 = memref.load %arg9[%c0_27, %c0_28] : memref<1x1xf32, #tpu.memory_space<smem>>
    memref.store %61, %arg9[%c0_27, %c0_28] : memref<1x1xf32, #tpu.memory_space<smem>>
    return
  }
  func.func @transform_0(%arg0: i32) -> (i32, i32, i32) {
    %c0_i32 = arith.constant 0 : i32
    %c0_i32_0 = arith.constant 0 : i32
    %c0_i32_1 = arith.constant 0 : i32
    return %c0_i32, %arg0, %c0_i32_0 : i32, i32, i32
  }
  func.func @transform_1(%arg0: i32) -> (i32, i32, i32) {
    %c0_i32 = arith.constant 0 : i32
    %c0_i32_0 = arith.constant 0 : i32
    %c0_i32_1 = arith.constant 0 : i32
    return %c0_i32, %arg0, %c0_i32_0 : i32, i32, i32
  }
  func.func @transform_2(%arg0: i32) -> (i32, i32, i32) {
    %c0_i32 = arith.constant 0 : i32
    %c0_i32_0 = arith.constant 0 : i32
    %c0_i32_1 = arith.constant 0 : i32
    return %c0_i32, %arg0, %c0_i32_0 : i32, i32, i32
  }
  func.func @transform_3(%arg0: i32) -> (i32, i32) {
    %c0_i32 = arith.constant 0 : i32
    %c0_i32_0 = arith.constant 0 : i32
    %c0_i32_1 = arith.constant 0 : i32
    return %c0_i32, %c0_i32_0 : i32, i32
  }
  func.func @transform_4(%arg0: i32) -> (i32, i32) {
    %c0_i32 = arith.constant 0 : i32
    %c0_i32_0 = arith.constant 0 : i32
    %c0_i32_1 = arith.constant 0 : i32
    return %c0_i32, %c0_i32_0 : i32, i32
  }
  func.func @transform_5(%arg0: i32) -> (i32, i32) {
    %c0_i32 = arith.constant 0 : i32
    %c0_i32_0 = arith.constant 0 : i32
    %c0_i32_1 = arith.constant 0 : i32
    return %c0_i32, %c0_i32_0 : i32, i32
  }
  func.func @transform_6(%arg0: i32) -> (i32, i32) {
    %c0_i32 = arith.constant 0 : i32
    %c0_i32_0 = arith.constant 0 : i32
    %c0_i32_1 = arith.constant 0 : i32
    return %c0_i32, %c0_i32_0 : i32, i32
  }
  func.func @transform_7(%arg0: i32) -> (i32, i32, i32) {
    %c0_i32 = arith.constant 0 : i32
    %c0_i32_0 = arith.constant 0 : i32
    %c0_i32_1 = arith.constant 0 : i32
    return %c0_i32, %arg0, %c0_i32_0 : i32, i32, i32
  }
  func.func @transform_8(%arg0: i32) -> (i32, i32) {
    %c0_i32 = arith.constant 0 : i32
    %c0_i32_0 = arith.constant 0 : i32
    return %arg0, %c0_i32 : i32, i32
  }
}

</mosaic_0001>

<bundles_post_ra>
// kernel: transformer_ner_forward.2
= control target key start
LH: loop header
LB: loop body
LE: loop exit
PB: predicated region body
PF: predicated region fallthrough
CT: control target
= control target key end

     0   :  { %vm25_vm0 = vcmask 261120   ;;  %v270_v5 = vmov 32.0   ;;  %s351_s0 = inlined_call_operand.vmem [shape: bf16[16,32], index: 0, kind: input, shape index: {}]   ;;  %s352_s2 = inlined_call_operand.vmem [shape: f32[1,128], index: 2, kind: input, shape index: {}]   ;;  %s353_s1 = inlined_call_operand.vmem [shape: bf16[32,128], index: 1, kind: input, shape index: {}]   ;;  %s354_s3 = inlined_call_operand.vmem [shape: bf16[128,128], index: 3, kind: input, shape index: {}]   ;;  %s355_s4 = inlined_call_operand.vmem [shape: f32[1,128], index: 4, kind: input, shape index: {}]   ;;  %s356_s5 = inlined_call_operand.vmem [shape: f32[16,128], index: 5, kind: output, shape index: {}]  }
   0x1   :  { %v258_v0 = vld [vmem:[%s351_s0] sm:$0xff]   ;;  %264 = vrcp.f32 %v270_v5  ;;  %v248_v22 = vld [vmem:[%s353_s1 + $0x8] sm:$0xff]  ;;  %v256_v27 = vld [vmem:[%s354_s3 + $0x38] sm:$0xff] }
   0x2   :  { %v259_v1 = vunpack.c.l.bf16 %v258_v0  ;;  %v260_v3 = vunpack.c.h.bf16 %v258_v0  ;;  %107 = vmatpush.bf16.msra.mxu0 %v248_v22  ;;  %v247_v23 = vld [vmem:[%s353_s1] sm:$0xff]  ;;  %186 = vmatpush.bf16.msra.mxu1 %v256_v27  ;;  %v255_v28 = vld [vmem:[%s354_s3 + $0x30] sm:$0xff]  ;;  %v254_v31 = vld [vmem:[%s354_s3 + $0x28] sm:$0xff] }
   0x3   :  { %v253_v35 = vld [vmem:[%s354_s3 + $0x20] sm:$0xff]  ;;  %v252_v51 = vld [vmem:[%s354_s3 + $0x18] sm:$0xff]  ;;  %v251_v52 = vld [vmem:[%s354_s3 + $0x10] sm:$0xff] }
   0x4   :  { %v26_v2 = vsel %vm25_vm0, %v259_v1, 0.0  ;;  %v29_v4 = vsel %vm25_vm0, %v260_v3, 0.0  ;;  %v250_v53 = vld [vmem:[%s354_s3 + $0x8] sm:$0xff]  ;;  %v249_v54 = vld [vmem:[%s354_s3] sm:$0xff] }
   0x5   :  { %27 = vadd.xlane.f32.xlu0 %v26_v2  ;;  %v262_v56 = vld [vmem:[%s352_s2] ss:$0 sm:$0xff] }
   0x6   :  { %108 = vmatpush.bf16.msra.mxu0 %v247_v23  ;;  %187 = vmatpush.bf16.msra.mxu1 %v255_v28  ;;  %v263_v63 = vld [vmem:[%s355_s4] ss:$0 sm:$0xff] }
   0x7   :  { %v265_v6 = vpop.eup %264 }
   0x8   :  { %v33_v7 = vmul.f32 32.0, %v265_v6  ;;  %vm37_vm1 = vweird.f32 %v265_v6 }
   0xa   :  { %v34_v8 = vsub.f32 1.0, %v33_v7  ;;  %188 = vmatpush.bf16.msra.mxu1 %v254_v31 }
   0xc   :  { %v35_v9 = vmul.f32 %v265_v6, %v34_v8 }
   0xd   :  { %30 = vadd.xlane.f32.xlu0 %v29_v4 }
   0xe   :  { %v36_v10 = vadd.f32 %v265_v6, %v35_v9  ;;  %189 = vmatpush.bf16.msra.mxu1 %v253_v35 }
  0x10   :  { %v38_v11 = vsel %vm37_vm1, %v265_v6, %v36_v10 }
  0x12   :  { %190 = vmatpush.bf16.msra.mxu1 %v252_v51 }
  0x16   :  { %191 = vmatpush.bf16.msra.mxu1 %v251_v52 }
  0x1a   :  { %192 = vmatpush.bf16.msra.mxu1 %v250_v53 }
  0x1e   :  { %193 = vmatpush.bf16.msra.mxu1 %v249_v54 }
  0x78   :  { %v28_v12 = vpop.xlane.xlu0 %27 }
  0x79   :  { %v39_v13 = vmul.f32 %v38_v11, %v28_v12 }
  0x7b   :  { %v41_v14 = vsub.f32 %v259_v1, %v39_v13 }
  0x7d   :  { %v43_v15 = vmul.f32 %v41_v14, %v41_v14 }
  0x7f   :  { %v45_v16 = vsel %vm25_vm0, %v43_v15, 0.0 }
  0x80   :  { %46 = vadd.xlane.f32.xlu1 %v45_v16  ;;  %v31_v17 = vpop.xlane.xlu0 %30 }
  0x81   :  { %v40_v18 = vmul.f32 %v38_v11, %v31_v17 }
  0x83   :  { %v42_v19 = vsub.f32 %v260_v3, %v40_v18 }
  0x85   :  { %v44_v20 = vmul.f32 %v42_v19, %v42_v19 }
  0x87   :  { %v48_v21 = vsel %vm25_vm0, %v44_v20, 0.0 }
  0x88   :  { %49 = vadd.xlane.f32.xlu1 %v48_v21 }
  0xf3   :  { %v47_v24 = vpop.xlane.xlu1 %46 }
  0xf4   :  { %v51_v25 = vmul.f32 %v47_v24, %v38_v11 }
  0xf6   :  { %v53_v26 = vadd.f32 1e-12, %v51_v25 }
  0xf8   :  { %266 = vrsqrt.f32 %v53_v26  ;;  %vm61_vm3 = vweird.f32 %v53_v26 }
  0xfb   :  { %v50_v29 = vpop.xlane.xlu1 %49 }
  0xfc   :  { %v52_v30 = vmul.f32 %v50_v29, %v38_v11 }
  0xfe   :  { %v267_v32 = vpop.eup %266  ;;  %v54_v33 = vadd.f32 1e-12, %v52_v30 }
  0xff   :  { %v56_v34 = vmul.f32 %v267_v32, %v53_v26  ;;  %vm62_vm2 = vweird.f32 %v267_v32 }
 0x100   :  { %268 = vrsqrt.f32 %v54_v33  ;;  %vm63_vm5 = vmor %vm61_vm3, %vm62_vm2  ;;  %vm71_vm6 = vweird.f32 %v54_v33 }
 0x101   :  { %v57_v36 = vmul.f32 %v267_v32, %v56_v34 }
 0x103   :  { %v58_v37 = vmul.f32 0.5, %v57_v36 }
 0x105   :  { %v59_v39 = vsub.f32 1.5, %v58_v37 }
 0x106   :  { %v269_v38 = vpop.eup %268 }
 0x107   :  { %v66_v40 = vmul.f32 %v269_v38, %v54_v33  ;;  %v60_v42 = vmul.f32 %v267_v32, %v59_v39  ;;  %vm72_vm4 = vweird.f32 %v269_v38 }
 0x108   :  { %vm73_vm7 = vmor %vm71_vm6, %vm72_vm4 }
 0x109   :  { %v67_v41 = vmul.f32 %v269_v38, %v66_v40  ;;  %v64_v46 = vsel %vm63_vm5, %v267_v32, %v60_v42 }
 0x10a   :  { %v75_v48 = vmul.f32 %v64_v46, %v41_v14 }
 0x10b   :  { %v68_v43 = vmul.f32 0.5, %v67_v41 }
 0x10d   :  { %v69_v44 = vsub.f32 1.5, %v68_v43 }
 0x10f   :  { %v70_v45 = vmul.f32 %v269_v38, %v69_v44 }
 0x111   :  { %v74_v47 = vsel %vm73_vm7, %v269_v38, %v70_v45 }
 0x112   :  { %v76_v49 = vmul.f32 %v74_v47, %v42_v19 }
 0x114   :  { %v77_v50 = vpack.c.bf16 %v76_v49, %v75_v48 }
 0x116   :  { %214 = vmatmul.msk.bf16.vlgmr.msra.gmra.mxu0 %vm25_vm0, %v77_v50 }
 0x193   :  { %v110_v55 = vpop.f32.mrf.mxu0 }
 0x194   :  { %v111_v57 = vadd.f32 %v262_v56, %v110_v55 }
 0x196   :  { %v115_v60 = vmax.f32 %v111_v57, 0.0 }
 0x19b   :  { %v112_v58 = vpop.f32.mrf.mxu0 }
 0x19c   :  { %v113_v59 = vadd.f32 %v262_v56, %v112_v58 }
 0x19e   :  { %v116_v61 = vmax.f32 %v113_v59, 0.0 }
 0x1a0   :  { %v117_v62 = vpack.c.bf16 %v116_v61, %v115_v60 }
 0x1a2   :  { %194 = vmatmul.bf16.vlgmr.msra.gmra.mxu1 %v117_v62 }
 0x21f   :  { %v195_v0 = vpop.f32.mrf.mxu1 }
 0x220   :  { %v196_v1 = vadd.f32 %v263_v63, %v195_v0 }
 0x222   :  { %200 = vst [vmem:[%s356_s5] sm:$0xff] %v196_v1 }
 0x227   :  { %v197_v2 = vpop.f32.mrf.mxu1 }
 0x228   :  { %v198_v3 = vadd.f32 %v263_v63, %v197_v2 }
 0x22a   :  { %201 = vst [vmem:[%s356_s5 + $0x8] sm:$0xff] %v198_v3 }

// kernel: transformer_ner_forward.3
= control target key start
LH: loop header
LB: loop body
LE: loop exit
PB: predicated region body
PF: predicated region fallthrough
CT: control target
= control target key end

     0   :  { %v976_v1 = vmov 0   ;;  %s1762_s0 = inlined_call_operand.vmem [shape: f32[8,2,128], index: 0, kind: input, shape index: {}]   ;;  %s1763_s1 = inlined_call_operand.vmem [shape: s32[8,2,1], index: 1, kind: input, shape index: {}]   ;;  %s1764_s2 = inlined_call_operand.vmem [shape: f32[8,2,1], index: 2, kind: input, shape index: {}]   ;;  %s1765_s3 = inlined_call_operand.vmem [shape: f32[1,128], index: 3, kind: input, shape index: {}]   ;;  %s1766_s4 = inlined_call_operand.vmem [shape: f32[128,128], index: 4, kind: input, shape index: {}]   ;;  %s1767_s5 = inlined_call_operand.vmem [shape: f32[128,128], index: 5, kind: input, shape index: {}]   ;;  %s1768_s6 = inlined_call_operand.vmem [shape: f32[1,128], index: 6, kind: input, shape index: {}]   ;;  %s1769_s7 = inlined_call_operand.vmem [shape: s32[8,2,1], index: 7, kind: output, shape index: {0}]   ;;  %s1770_s8 = inlined_call_operand.hbm [shape: f32[1,1], index: 8, kind: output, shape index: {1}]  }
   0x1   :  { %v83_v0 = vld [vmem:[%s1763_s1] sm:$0x3]  ;;  %854 = vset.pattern.permute.xlu0 %v976_v1 }
   0x2   :  { %14 = vsyncpa [#allocation4], 0  ;;  %85 = vperm.xlu0 %854, %v83_v0   ;;  %v63_v2 = vlaneseq  ;;  %v855_v19 = vld [vmem:[%s1765_s3] ss:$0 sm:$0xff]  ;;  %vm1779_vm0 = vcmask 1041408   ;;  %v977_v24 = vmov 0.0  }
   0x3   :  { %v82_v20 = vld [vmem:[%s1762_s0] sm:$0x3]  ;;  %v1094_v29 = vld [vmem:[%s1766_s4 + $0x8] sm:$0xff]  ;;  %v1099_v30 = vld [vmem:[%s1766_s4 + $0x10] sm:$0xff]  ;;  %s1261_s28 = smov 1  }
   0x4   :  { %v1029_v3 = vshrl.u32 %v63_v2, 7  ;;  %v1082_v21 = vand.u32 127, %v63_v2  ;;  %v93_v22 = vadd.f32 %v855_v19, %v82_v20   ;;  %v1089_v28 = vld [vmem:[%s1766_s4] sm:$0xff]  ;;  %1785 = vst [vmem:[#allocation7_spill] sm:$0xff] %v1094_v29  ;;  %v1104_v31 = vld [vmem:[%s1766_s4 + $0x18] sm:$0xff]  ;;  %v1114_v33 = vld [vmem:[%s1766_s4 + $0x28] sm:$0xff] }
   0x5   :  { %1784 = vst [vmem:[#allocation6_spill] sm:$0xff] %v1089_v28  ;;  %v1109_v32 = vld [vmem:[%s1766_s4 + $0x20] sm:$0xff]  ;;  %v1119_v34 = vld [vmem:[%s1766_s4 + $0x30] sm:$0xff]  ;;  %v1124_v35 = vld [vmem:[%s1766_s4 + $0x38] sm:$0xff] }
   0x6   :  { %v1032_v4 = vadd.s32 8, %v1029_v3  ;;  %v1035_v5 = vadd.s32 16, %v1029_v3  ;;  %v1038_v6 = vadd.s32 24, %v1029_v3  ;;  %v1041_v7 = vadd.s32 32, %v1029_v3  ;;  %1786 = vst [vmem:[#allocation8_spill] sm:$0xff] %v1099_v30  ;;  %v1129_v36 = vld [vmem:[%s1766_s4 + $0x40] sm:$0xff] }
   0x7   :  { %v1044_v8 = vadd.s32 40, %v1029_v3  ;;  %v1047_v9 = vadd.s32 48, %v1029_v3  ;;  %v1050_v10 = vadd.s32 56, %v1029_v3  ;;  %v1053_v11 = vadd.s32 64, %v1029_v3  ;;  %1787 = vst [vmem:[#allocation9_spill] sm:$0xff] %v1104_v31  ;;  %v1134_v37 = vld [vmem:[%s1766_s4 + $0x48] sm:$0xff] }
   0x8   :  { %v1056_v12 = vadd.s32 72, %v1029_v3  ;;  %v1059_v13 = vadd.s32 80, %v1029_v3  ;;  %v1062_v14 = vadd.s32 88, %v1029_v3  ;;  %v1065_v15 = vadd.s32 96, %v1029_v3  ;;  %v1139_v38 = vld [vmem:[%s1766_s4 + $0x50] sm:$0xff]  ;;  %v1144_v39 = vld [vmem:[%s1766_s4 + $0x58] sm:$0xff] }
   0x9   :  { %v1068_v16 = vadd.s32 104, %v1029_v3  ;;  %v1071_v17 = vadd.s32 112, %v1029_v3  ;;  %v1074_v18 = vadd.s32 120, %v1029_v3  ;;  %v1149_v40 = vld [vmem:[%s1766_s4 + $0x60] sm:$0xff]  ;;  %v1154_v41 = vld [vmem:[%s1766_s4 + $0x68] sm:$0xff]  ;;  %v1159_v42 = vld [vmem:[%s1766_s4 + $0x70] sm:$0xff]  ;;  %v1810_v63 = vmov %v93_v22 }
   0xa   :  { %1788 = vst [vmem:[#allocation10_spill] sm:$0xff] %v1149_v40  ;;  %v1164_v43 = vld [vmem:[%s1766_s4 + $0x78] sm:$0xff]  ;;  %v1169_v44 = vld [vmem:[%s1767_s5] sm:$0xff]  ;;  %v1174_v45 = vld [vmem:[%s1767_s5 + $0x8] sm:$0xff] }
   0xb   :  { %1789 = vst [vmem:[#allocation11_spill] sm:$0xff] %v1154_v41  ;;  %v1179_v46 = vld [vmem:[%s1767_s5 + $0x10] sm:$0xff]  ;;  %v1184_v47 = vld [vmem:[%s1767_s5 + $0x18] sm:$0xff]  ;;  %v1189_v48 = vld [vmem:[%s1767_s5 + $0x20] sm:$0xff] }
   0xc   :  { %1790 = vst [vmem:[#allocation12_spill] sm:$0xff] %v1159_v42  ;;  %v1194_v49 = vld [vmem:[%s1767_s5 + $0x28] sm:$0xff]  ;;  %v1199_v50 = vld [vmem:[%s1767_s5 + $0x30] sm:$0xff]  ;;  %v1204_v51 = vld [vmem:[%s1767_s5 + $0x38] sm:$0xff] }
   0xd   :  { %1791 = vst [vmem:[#allocation13_spill] sm:$0xff] %v1164_v43  ;;  %v1209_v52 = vld [vmem:[%s1767_s5 + $0x40] sm:$0xff]  ;;  %v1214_v53 = vld [vmem:[%s1767_s5 + $0x48] sm:$0xff]  ;;  %v1219_v54 = vld [vmem:[%s1767_s5 + $0x50] sm:$0xff] }
   0xe   :  { %1792 = vst [vmem:[#allocation14_spill] sm:$0xff] %v1169_v44  ;;  %v1224_v55 = vld [vmem:[%s1767_s5 + $0x58] sm:$0xff]  ;;  %v1229_v56 = vld [vmem:[%s1767_s5 + $0x60] sm:$0xff]  ;;  %v1234_v57 = vld [vmem:[%s1767_s5 + $0x68] sm:$0xff] }
   0xf   :  { %1793 = vst [vmem:[#allocation15_spill] sm:$0xff] %v1174_v45  ;;  %v1239_v58 = vld [vmem:[%s1767_s5 + $0x70] sm:$0xff]  ;;  %v1244_v59 = vld [vmem:[%s1767_s5 + $0x78] sm:$0xff]  ;;  %v1249_v60 = vld [vmem:[%s1768_s6] sm:$0x1] }
  0x10   :  { %1794 = vst [vmem:[#allocation16_spill] sm:$0xff] %v1179_v46 }
  0x11   :  { %1795 = vst [vmem:[#allocation17_spill] sm:$0xff] %v1184_v47 }
  0x12   :  { %1796 = vst [vmem:[#allocation18_spill] sm:$0xff] %v1189_v48 }
  0x13   :  { %1797 = vst [vmem:[#allocation19_spill] sm:$0xff] %v1194_v49 }
  0x14   :  { %1798 = vst [vmem:[#allocation20_spill] sm:$0xff] %v1199_v50 }
  0x15   :  { %1799 = vst [vmem:[#allocation21_spill] sm:$0xff] %v1204_v51 }
  0x16   :  { %1800 = vst [vmem:[#allocation22_spill] sm:$0xff] %v1209_v52 }
  0x17   :  { %1801 = vst [vmem:[#allocation23_spill] sm:$0xff] %v1214_v53 }
  0x18   :  { %1802 = vst [vmem:[#allocation24_spill] sm:$0xff] %v1219_v54 }
  0x19   :  { %1803 = vst [vmem:[#allocation25_spill] sm:$0xff] %v1224_v55 }
  0x1a   :  { %1804 = vst [vmem:[#allocation26_spill] sm:$0xff] %v1229_v56 }
  0x1b   :  { %1805 = vst [vmem:[#allocation27_spill] sm:$0xff] %v1234_v57 }
  0x1c   :  { %1806 = vst [vmem:[#allocation28_spill] sm:$0xff] %v1239_v58 }
  0x1d   :  { %1807 = vst [vmem:[#allocation29_spill] sm:$0xff] %v1244_v59 }
  0x1e   :  { %1808 = vst [vmem:[#allocation30_spill] sm:$0xff] %v1249_v60 }
  0x74   :  { %v86_v23 = vpop.permute.xlu0 %85 }
  0x75   :  { %vm87_vm1 = vcmp.eq.s32.totalorder %v1082_v21, %v86_v23 }
  0x76   :  { %v777_v25 = vsel %vm87_vm1, 1.0, %v977_v24   ;;  %v94_v26 = vsel %vm87_vm1, %v93_v22, 0.0 }
  0x77   :  { %v96_v27 = vsel %vm1779_vm0, %v94_v26, 0.0  ;;  %v1809_v62 = vmov %v777_v25 }
  0x78   :  { %97 = vadd.xlane.f32.xlu0 %v96_v27 }
  0xeb   :  { %v98_v61 = vpop.xlane.xlu0 %97  }
  0xec LB: > { %v1811_v31 = vld [vmem:[#allocation9_spill] sm:$0xff]  ;;  %v1812_v30 = vld [vmem:[#allocation8_spill] sm:$0xff]  ;;  %v1813_v29 = vld [vmem:[#allocation7_spill] sm:$0xff]  ;;  %1819 = vst [vmem:[#allocation31_spill] sm:$0xff] %v954_v61  ;;  %860 = vset.pattern.permute.xlu2 %v1038_v6  ;;  %858 = vset.pattern.permute.xlu1 %v1032_v4  ;;  %v1771_v0 = vmov 0   ;;  %s1284_s5 = sshll.u32 %s966_s28, 1  ;;  %v950_v25 = vphi %v777_v25, %v1478_v25   ;;  %v946_v62 = vphi %v1809_v62, %v1854_v62   ;;  %s966_s28 = sphi %s1261_s28, %s104_s28   ;;  %v962_v22 = vphi %v93_v22, %v1857_v22   ;;  %v958_v63 = vphi %v1810_v63, %v1856_v63   ;;  %v954_v61 = vphi %v98_v61, %v1855_v61  }
  0xed   : > { %v1814_v28 = vld [vmem:[#allocation6_spill] sm:$0xff]  ;;  %v1816_v42 = vld [vmem:[#allocation12_spill] sm:$0xff]  ;;  %v1817_v41 = vld [vmem:[#allocation11_spill] sm:$0xff]  ;;  %1820 = vst [vmem:[#allocation32_spill] sm:$0xff] %v958_v63  ;;  %856 = vset.pattern.permute.xlu0 %v1771_v0  ;;  %s115_s30 = scalar_lea.vmem %s1763_s1, %s1284_s5  ;;  %v1293_v2 = vperm.slane %v962_v22, 0  ;;  %vm1837_vm0 = vcmask 1041408   ;;  %s113_s11 = scalar_lea.vmem %s1764_s2, %s1284_s5 }
  0xee   : > { %v1815_v40 = vld [vmem:[#allocation10_spill] sm:$0xff]  ;;  %v1818_v43 = vld [vmem:[#allocation13_spill] sm:$0xff]  ;;  %v116_v1 = vld [vmem:[%s115_s30] sm:$0x3]  ;;  %v543_v19 = vsel %vm1837_vm0, %v958_v63, -inf  ;;  %v1354_v20 = vperm.slane %v962_v22, 1  ;;  %s111_s13 = scalar_lea.vmem %s1762_s0, %s1284_s5 }
  0xef   : > { %580 = vmatpush.msra.mxu1 %v1818_v43  ;;  %v1821_v59 = vld [vmem:[#allocation29_spill] sm:$0xff]  ;;  %v1822_v58 = vld [vmem:[#allocation28_spill] sm:$0xff]  ;;  %118 = vperm.xlu0 %856, %v116_v1   ;;  %v1823_v57 = vld [vmem:[#allocation27_spill] sm:$0xff]  ;;  %s535_s14 = scalar_lea.vmem [#allocation2], %s1284_s5  ;;  %s104_s28 = sadd.s32 1, %s966_s28  }
  0xf0   : > { %549 = vmatpush.msra.mxu0 %v1821_v59  ;;  %v1824_v56 = vld [vmem:[#allocation26_spill] sm:$0xff]  ;;  %v1825_v55 = vld [vmem:[#allocation25_spill] sm:$0xff]  ;;  %v1826_v54 = vld [vmem:[#allocation24_spill] sm:$0xff]  ;;  %p101_p0 = scmp.ge.s32.totalorder %s104_s28, 8  }
  0xf1   : > { %581 = vmatpush.msra.mxu1 %v1816_v42  ;;  %v1827_v53 = vld [vmem:[#allocation23_spill] sm:$0xff]  ;;  %v1828_v52 = vld [vmem:[#allocation22_spill] sm:$0xff]  ;;  %v1829_v51 = vld [vmem:[#allocation21_spill] sm:$0xff]  ;;  %s1741_s2 = smov (%p101_p0), 0  }
  0xf2   : > { %550 = vmatpush.msra.mxu0 %v1822_v58  ;;  %v1830_v50 = vld [vmem:[#allocation20_spill] sm:$0xff]  ;;  %v1831_v49 = vld [vmem:[#allocation19_spill] sm:$0xff]  ;;  %v1832_v48 = vld [vmem:[#allocation18_spill] sm:$0xff] }
  0xf3   : > { %582 = vmatpush.msra.mxu1 %v1817_v41  ;;  %v1833_v47 = vld [vmem:[#allocation17_spill] sm:$0xff]  ;;  %v1834_v46 = vld [vmem:[#allocation16_spill] sm:$0xff]  ;;  %v1835_v45 = vld [vmem:[#allocation15_spill] sm:$0xff] }
  0xf4   : > { %551 = vmatpush.msra.mxu0 %v1823_v57  ;;  %146 = vperm.xlu2 %860, %v1293_v2   ;;  %v1836_v44 = vld [vmem:[#allocation14_spill] sm:$0xff]  ;;  %v1365_v23 = vld [vmem:[%s113_s11] sm:$0x3] }
  0xf5   : > { %583 = vmatpush.msra.mxu1 %v1815_v40  ;;  %134 = vperm.xlu1 %858, %v1293_v2   ;;  %1838 = vst [vmem:[#allocation33_spill] sm:$0xff] %v1365_v23  ;;  %v617_v22 = vsub.f32 1.0, %v1365_v23  ;;  %vm573_vm2 = vcmp.gt.f32.partialorder %v1365_v23, 0.0 }
  0xf6   : > { %552 = vmatpush.msra.mxu0 %v1824_v56 }
  0xf7   : > { %584 = vmatpush.msra.mxu1 %v1144_v39  ;;  %857 = vset.pattern.permute.xlu0 %v1029_v3 }
  0xf8   : > { %553 = vmatpush.msra.mxu0 %v1825_v55  ;;  %v1839_v55 = vmov 0  }
  0xf9   : > { %585 = vmatpush.msra.mxu1 %v1139_v38 }
  0xfa   : > { %554 = vmatpush.msra.mxu0 %v1826_v54 }
  0xfb   : > { %586 = vmatpush.msra.mxu1 %v1134_v37 }
  0xfc   : > { %861 = vset.pattern.permute.xlu2 %v1041_v7  ;;  %555 = vmatpush.msra.mxu0 %v1827_v53 }
  0xfd   : > { %587 = vmatpush.msra.mxu1 %v1129_v36  ;;  %859 = vset.pattern.permute.xlu1 %v1035_v5 }
  0xfe   : > { %556 = vmatpush.msra.mxu0 %v1828_v52 }
  0xff   : > { %588 = vmatpush.msra.mxu1 %v1124_v35  ;;  %128 = vperm.xlu0 %857, %v1293_v2  }
 0x100   : > { %557 = vmatpush.msra.mxu0 %v1829_v51 }
 0x101   : > { %589 = vmatpush.msra.mxu1 %v1119_v34 }
 0x102   : > { %558 = vmatpush.msra.mxu0 %v1830_v50 }
 0x103   : > { %590 = vmatpush.msra.mxu1 %v1114_v33 }
 0x104   : > { %152 = vperm.xlu2 %861, %v1293_v2   ;;  %559 = vmatpush.msra.mxu0 %v1831_v49 }
 0x105   : > { %591 = vmatpush.msra.mxu1 %v1109_v32  ;;  %140 = vperm.xlu1 %859, %v1293_v2  }
 0x106   : > { %560 = vmatpush.msra.mxu0 %v1832_v48 }
 0x107   : > { %592 = vmatpush.msra.mxu1 %v1811_v31  ;;  %864 = vset.pattern.permute.xlu0 %v1050_v10 }
 0x108   : > { %561 = vmatpush.msra.mxu0 %v1833_v47 }
 0x109   : > { %593 = vmatpush.msra.mxu1 %v1812_v30 }
 0x10a   : > { %562 = vmatpush.msra.mxu0 %v1834_v46 }
 0x10b   : > { %594 = vmatpush.msra.mxu1 %v1813_v29 }
 0x10c   : > { %863 = vset.pattern.permute.xlu2 %v1047_v9  ;;  %563 = vmatpush.msra.mxu0 %v1835_v45 }
 0x10d   : > { %595 = vmatpush.msra.mxu1 %v1814_v28  ;;  %862 = vset.pattern.permute.xlu1 %v1044_v8 }
 0x10e   : > { %596 = vmatmul.f32.vlgmr.msra.gmra.mxu1 %v950_v25  ;;  %564 = vmatpush.msra.mxu0 %v1836_v44 }
 0x10f   : > { %170 = vperm.xlu0 %864, %v1293_v2  }
 0x114   : > { %164 = vperm.xlu2 %863, %v1293_v2  }
 0x115   : > { %158 = vperm.xlu1 %862, %v1293_v2  }
 0x117   : > { %881 = vset.pattern.permute.xlu0 %v1053_v11 }
 0x11c   : > { %866 = vset.pattern.permute.xlu2 %v1056_v12 }
 0x11d   : > { %865 = vset.pattern.permute.xlu1 %v1053_v11 }
 0x124   : > { %182 = vperm.xlu2 %866, %v1293_v2  }
 0x125   : > { %176 = vperm.xlu1 %865, %v1293_v2  }
 0x12c   : > { %868 = vset.pattern.permute.xlu2 %v1062_v14 }
 0x12d   : > { %867 = vset.pattern.permute.xlu1 %v1059_v13 }
 0x134   : > { %194 = vperm.xlu2 %868, %v1293_v2  }
 0x135   : > { %188 = vperm.xlu1 %867, %v1293_v2  }
 0x139   : > { %544 = vmax.xlane.f32.xlu0 %v543_v19 }
 0x13c   : > { %870 = vset.pattern.permute.xlu2 %v1068_v16 }
 0x13d   : > { %869 = vset.pattern.permute.xlu1 %v1065_v15 }
 0x144   : > { %206 = vperm.xlu2 %870, %v1293_v2  }
 0x145   : > { %200 = vperm.xlu1 %869, %v1293_v2  }
 0x14c   : > { %872 = vset.pattern.permute.xlu2 %v1074_v18 }
 0x14d   : > { %871 = vset.pattern.permute.xlu1 %v1071_v17  ;;  %273 = vperm.xlu0 %881, %v1354_v20  }
 0x14e   : > { %v147_v24 = vpop.permute.xlu2 %146 }
 0x14f   : > { %v1375_v26 = vadd.f32 %v147_v24, %v1811_v31 }
 0x154   : > { %218 = vperm.xlu2 %872, %v1293_v2  }
 0x155   : > { %212 = vperm.xlu1 %871, %v1293_v2   ;;  %889 = vset.pattern.permute.xlu0 %v1771_v0 }
 0x156   : > { %613 = vperm.xlu0 %889, %v1365_v23  }
 0x15c   : > { %874 = vset.pattern.permute.xlu2 %v1032_v4 }
 0x15d   : > { %873 = vset.pattern.permute.xlu1 %v1029_v3 }
 0x15e   : > { %620 = vperm.xlu0 %889, %v617_v22   ;;  %v153_v19 = vpop.permute.xlu2 %152 }
 0x15f   : > { %v1395_v45 = vadd.f32 %v153_v19, %v1109_v32 }
 0x161   : > { %v1382_v2 = vpop.permute.xlu0 %118 }
 0x162   : > { %vm1778_vm3 = vcmp.eq.s32.totalorder %v1082_v21, %v1382_v2 }
 0x164   : > { %231 = vperm.xlu2 %874, %v1354_v20  }
 0x165   : > { %225 = vperm.xlu1 %873, %v1354_v20  }
 0x167   : > { %v135_v25 = vpop.permute.xlu1 %134 }
 0x168   : > { %v1378_v27 = vadd.f32 %v135_v25, %v1813_v29 }
 0x16a   : > { %v350_v1 = vmax.f32 %v1378_v27, %v1375_v26 }
 0x16c   : > { %876 = vset.pattern.permute.xlu2 %v1038_v6 }
 0x16d   : > { %875 = vset.pattern.permute.xlu1 %v1035_v5 }
 0x16e   : > { %v165_v0 = vpop.permute.xlu2 %164 }
 0x16f   : > { %v1400_v47 = vadd.f32 %v165_v0, %v1119_v34 }
 0x171   : > { %v129_v22 = vpop.permute.xlu0 %128 }
 0x172   : > { %v1389_v24 = vadd.f32 %v129_v22, %v1814_v28 }
 0x174   : > { %243 = vperm.xlu2 %876, %v1354_v20  }
 0x175   : > { %237 = vperm.xlu1 %875, %v1354_v20  }
 0x177   : > { %v141_v25 = vpop.permute.xlu1 %140 }
 0x178   : > { %v1392_v44 = vadd.f32 %v141_v25, %v1812_v30 }
 0x17a   : > { %v349_v46 = vmax.f32 %v1389_v24, %v1392_v44 }
 0x17c   : > { %v351_v48 = vmax.f32 %v349_v46, %v1395_v45  ;;  %878 = vset.pattern.permute.xlu2 %v1044_v8 }
 0x17d   : > { %877 = vset.pattern.permute.xlu1 %v1041_v7 }
 0x17e   : > { %v353_v22 = vmax.f32 %v351_v48, %v1400_v47  ;;  %v183_v19 = vpop.permute.xlu2 %182 }
 0x17f   : > { %v1415_v46 = vadd.f32 %v183_v19, %v1134_v37 }
 0x181   : > { %v171_v25 = vpop.permute.xlu0 %170 }
 0x182   : > { %v1412_v0 = vadd.f32 %v171_v25, %v1124_v35 }
 0x184   : > { %255 = vperm.xlu2 %878, %v1354_v20  }
 0x185   : > { %249 = vperm.xlu1 %877, %v1354_v20  }
 0x187   : > { %v159_v49 = vpop.permute.xlu1 %158 }
 0x188   : > { %v1409_v50 = vadd.f32 %v159_v49, %v1114_v33 }
 0x18a   : > { %v352_v51 = vmax.f32 %v350_v1, %v1409_v50 }
 0x18c   : > { %v354_v48 = vmax.f32 %v352_v51, %v1412_v0  ;;  %880 = vset.pattern.permute.xlu2 %v1050_v10 }
 0x18d   : > { %879 = vset.pattern.permute.xlu1 %v1047_v9 }
 0x18e   : > { %v356_v52 = vmax.f32 %v354_v48, %v1415_v46  ;;  %v195_v53 = vpop.permute.xlu2 %194 }
 0x18f   : > { %v1423_v49 = vadd.f32 %v195_v53, %v1144_v39 }
 0x191   : > { %v358_v25 = vmax.f32 %v356_v52, %v1423_v49 }
 0x194   : > { %267 = vperm.xlu2 %880, %v1354_v20  }
 0x195   : > { %261 = vperm.xlu1 %879, %v1354_v20  }
 0x197   : > { %v177_v19 = vpop.permute.xlu1 %176 }
 0x198   : > { %v1429_v1 = vadd.f32 %v177_v19, %v1129_v36 }
 0x19a   : > { %v355_v51 = vmax.f32 %v353_v22, %v1429_v1 }
 0x19c   : > { %883 = vset.pattern.permute.xlu2 %v1059_v13 }
 0x19d   : > { %882 = vset.pattern.permute.xlu1 %v1056_v12 }
 0x19e   : > { %v207_v59 = vpop.permute.xlu2 %206 }
 0x19f   : > { %v1459_v60 = vadd.f32 %v207_v59, %v1817_v41  ;;  %v979_v41 = vmov 0.0  }
 0x1a4   : > { %285 = vperm.xlu2 %883, %v1354_v20  }
 0x1a5   : > { %279 = vperm.xlu1 %882, %v1354_v20  }
 0x1a7   : > { %v189_v53 = vpop.permute.xlu1 %188 }
 0x1a8   : > { %v1437_v52 = vadd.f32 %v189_v53, %v1139_v38 }
 0x1aa   : > { %v357_v48 = vmax.f32 %v355_v51, %v1437_v52  ;;  %v574_v51 = vsel %vm573_vm2, 1, %v1839_v55 }
 0x1ab   : > { %576 = vperm.xlu0 %889, %v574_v51  }
 0x1ac   : > { %885 = vset.pattern.permute.xlu2 %v1065_v15  ;;  %v1442_v19 = vpop.xlane.xlu0 %544 }
 0x1ad   : > { %884 = vset.pattern.permute.xlu1 %v1062_v14  ;;  %v546_v22 = vsub.f32 %v958_v63, %v1442_v19 }
 0x1af   : > { %v547_v54 = vmul.f32 1.442695, %v546_v22  ;;  %v219_v22 = vpop.permute.xlu2 %218 }
 0x1b0   : > { %v1464_v55 = vadd.f32 %v219_v22, %v1818_v43 }
 0x1b1   : > { %890 = vpow2.f32 %v547_v54 }
 0x1b4   : > { %297 = vperm.xlu2 %885, %v1354_v20  }
 0x1b5   : > { %291 = vperm.xlu1 %884, %v1354_v20  }
 0x1b7   : > { %v201_v53 = vpop.permute.xlu1 %200  ;;  %v891_v57 = vpop.eup %890 }
 0x1b8   : > { %v1451_v56 = vadd.f32 %v201_v53, %v1815_v40  ;;  %565 = vmatmul.f32.vlgmr.msra.gmra.mxu0 %v891_v57  ;;  %v360_v57 = vmax.f32 %v358_v25, %v1459_v60  ;;  %v1478_v25 = vsel %vm1778_vm3, 1.0, %v979_v41  }
 0x1ba   : > { %v359_v58 = vmax.f32 %v357_v48, %v1451_v56  ;;  %v362_v51 = vmax.f32 %v360_v57, %v1464_v55 }
 0x1bc   : > { %887 = vset.pattern.permute.xlu2 %v1071_v17 }
 0x1bd   : > { %886 = vset.pattern.permute.xlu1 %v1068_v16 }
 0x1bf   : > { %v1456_v54 = vpop.permute.xlu0 %273 }
 0x1c4   : > { %309 = vperm.xlu2 %887, %v1354_v20  }
 0x1c5   : > { %303 = vperm.xlu1 %886, %v1354_v20  }
 0x1c7   : > { %v213_v48 = vpop.permute.xlu1 %212 }
 0x1c8   : > { %v1468_v53 = vadd.f32 %v213_v48, %v1816_v42  ;;  %v614_v23 = vpop.permute.xlu0 %613 }
 0x1ca   : > { %v361_v61 = vmax.f32 %v359_v58, %v1468_v53  ;;  %v616_v58 = vmul.f32 %v1478_v25, %v614_v23 }
 0x1cc   : > { %v363_v59 = vmax.f32 %v361_v61, %v362_v51 }
 0x1cd   : > { %888 = vset.pattern.permute.xlu1 %v1074_v18 }
 0x1ce   : > { %v364_v63 = vrot.slane %v363_v59, 4 }
 0x1d0   : > { %v365_v22 = vmax.f32 %v363_v59, %v364_v63  ;;  %v621_v48 = vpop.permute.xlu0 %620 }
 0x1d1   : > { %v623_v61 = vmul.f32 %v946_v62, %v621_v48 }
 0x1d2   : > { %v366_v43 = vrot.slane %v365_v22, 2 }
 0x1d3   : > { %v1483_v62 = vadd.f32 %v623_v61, %v616_v58  }
 0x1d4   : > { %v367_v57 = vmax.f32 %v365_v22, %v366_v43 }
 0x1d5   : > { %315 = vperm.xlu1 %888, %v1354_v20   ;;  %v1840_v42 = vmov %v1483_v62 }
 0x1d6   : > { %v368_v51 = vrot.slane %v367_v57, 1 }
 0x1d8   : > { %v1485_v40 = vmax.f32 %v367_v57, %v368_v51 }
 0x1da   : > { %vm391_vm4 = vcmp.eq.f32.partialorder %v1389_v24, %v1485_v40  ;;  %vm392_vm5 = vcmp.eq.f32.partialorder %v1378_v27, %v1485_v40  ;;  %vm393_vm6 = vcmp.eq.f32.partialorder %v1392_v44, %v1485_v40  ;;  %vm394_vm7 = vcmp.eq.f32.partialorder %v1375_v26, %v1485_v40  ;;  %v597_v27 = vpop.f32.mrf.mxu1 }
 0x1db   : > { %vm395_vm8 = vcmp.eq.f32.partialorder %v1395_v45, %v1485_v40  ;;  %vm396_vm9 = vcmp.eq.f32.partialorder %v1409_v50, %v1485_v40  ;;  %vm397_vm10 = vcmp.eq.f32.partialorder %v1400_v47, %v1485_v40  ;;  %vm398_vm11 = vcmp.eq.f32.partialorder %v1412_v0, %v1485_v40 }
 0x1dc   : > { %vm399_vm12 = vcmp.eq.f32.partialorder %v1429_v1, %v1485_v40  ;;  %vm400_vm13 = vcmp.eq.f32.partialorder %v1415_v46, %v1485_v40  ;;  %vm401_vm14 = vcmp.eq.f32.partialorder %v1437_v52, %v1485_v40  ;;  %vm402_vm15 = vcmp.eq.f32.partialorder %v1423_v49, %v1485_v40 }
 0x1dd   : > { %vm403_vm1 = vcmp.eq.f32.partialorder %v1451_v56, %v1485_v40  ;;  %vm405_vm2 = vcmp.eq.f32.partialorder %v1468_v53, %v1485_v40  ;;  %v423_v41 = vsel %vm391_vm4, %v1029_v3, 128  ;;  %v424_v43 = vsel %vm392_vm5, %v1032_v4, 128 }
 0x1de   : > { %v425_v44 = vsel %vm393_vm6, %v1035_v5, 128  ;;  %v426_v62 = vsel %vm394_vm7, %v1038_v6, 128  ;;  %v427_v63 = vsel %vm395_vm8, %v1041_v7, 128  ;;  %v428_v20 = vsel %vm396_vm9, %v1044_v8, 128 }
 0x1df   : > { %vm455_vm3 = vcmp.lt.s32.totalorder %v423_v41, %v425_v44  ;;  %vm457_vm0 = vcmp.lt.s32.totalorder %v424_v43, %v426_v62  ;;  %v429_v24 = vsel %vm397_vm10, %v1047_v9, 128  ;;  %v430_v45 = vsel %vm398_vm11, %v1050_v10, 128 }
 0x1e0   : > { %v456_v23 = vsel %vm455_vm3, %v423_v41, %v425_v44  ;;  %v458_v26 = vsel %vm457_vm0, %v424_v43, %v426_v62  ;;  %v431_v50 = vsel %vm399_vm12, %v1053_v11, 128  ;;  %v432_v47 = vsel %vm400_vm13, %v1056_v12, 128 }
 0x1e1   : > { %vm459_vm4 = vcmp.lt.s32.totalorder %v456_v23, %v427_v63  ;;  %vm461_vm5 = vcmp.lt.s32.totalorder %v458_v26, %v428_v20  ;;  %v600_v58 = vmul.f32 %v1478_v25, %v597_v27  ;;  %vm404_vm0 = vcmp.eq.f32.partialorder %v1459_v60, %v1485_v40  ;;  %v232_v27 = vpop.permute.xlu2 %231 }
 0x1e2   : > { %v460_v59 = vsel %vm459_vm4, %v456_v23, %v427_v63  ;;  %v462_v22 = vsel %vm461_vm5, %v458_v26, %v428_v20  ;;  %v433_v0 = vsel %vm401_vm14, %v1059_v13, 128  ;;  %v434_v46 = vsel %vm402_vm15, %v1062_v14, 128  ;;  %v1573_v23 = vld [vmem:[%s111_s13] sm:$0x3] }
 0x1e3   : > { %vm463_vm6 = vcmp.lt.s32.totalorder %v460_v59, %v429_v24  ;;  %vm465_vm7 = vcmp.lt.s32.totalorder %v462_v22, %v430_v45  ;;  %vm406_vm9 = vcmp.eq.f32.partialorder %v1464_v55, %v1485_v40  ;;  %v435_v60 = vsel %vm403_vm1, %v1065_v15, 128 }
 0x1e4   : > { %v464_v48 = vsel %vm463_vm6, %v460_v59, %v429_v24  ;;  %v466_v57 = vsel %vm465_vm7, %v462_v22, %v430_v45  ;;  %v436_v52 = vsel %vm404_vm0, %v1068_v16, 128  ;;  %vm1841_vm14 = vcmask 1041408   ;;  %v226_v24 = vpop.permute.xlu1 %225 }
 0x1e5   : > { %vm467_vm3 = vcmp.lt.s32.totalorder %v464_v48, %v431_v50  ;;  %vm469_vm8 = vcmp.lt.s32.totalorder %v466_v57, %v432_v47  ;;  %v601_v49 = vsel %vm1841_vm14, %v600_v58, 0.0  ;;  %v437_v55 = vsel %vm405_vm2, %v1071_v17, 128  ;;  %vm1843_vm5 = vmmov %vm1841_vm14 }
 0x1e6   : > { %v468_v1 = vsel %vm467_vm3, %v464_v48, %v431_v50  ;;  %v470_v61 = vsel %vm469_vm8, %v466_v57, %v432_v47  ;;  %v438_v43 = vsel %vm406_vm9, %v1074_v18, 128  ;;  %vm1842_vm2 = vcmp.eq.s32.totalorder %v1082_v21, %v1382_v2 }
 0x1e7   : > { %vm471_vm10 = vcmp.lt.s32.totalorder %v468_v1, %v433_v0  ;;  %vm473_vm11 = vcmp.lt.s32.totalorder %v470_v61, %v434_v46  ;;  %v604_v53 = vsel %vm1842_vm2, %v1573_v23, 0.0 }
 0x1e8   : > { %v472_v51 = vsel %vm471_vm10, %v468_v1, %v433_v0  ;;  %v474_v41 = vsel %vm473_vm11, %v470_v61, %v434_v46  ;;  %v605_v26 = vsel %vm1843_vm5, %v604_v53, 0.0  ;;  %v333_v1 = vadd.f32 %v226_v24, %v1814_v28 }
 0x1e9   : > { %vm475_vm12 = vcmp.lt.s32.totalorder %v472_v51, %v435_v60  ;;  %vm477_vm13 = vcmp.lt.s32.totalorder %v474_v41, %v436_v52  ;;  %v244_v59 = vpop.permute.xlu2 %243 }
 0x1ea   : > { %v476_v44 = vsel %vm475_vm12, %v472_v51, %v435_v60  ;;  %v478_v62 = vsel %vm477_vm13, %v474_v41, %v436_v52  ;;  %v334_v60 = vadd.f32 %v232_v27, %v1813_v29  ;;  %v336_v52 = vadd.f32 %v244_v59, %v1811_v31 }
 0x1eb   : > { %vm479_vm15 = vcmp.lt.s32.totalorder %v476_v44, %v437_v55  ;;  %vm481_vm1 = vcmp.lt.s32.totalorder %v478_v62, %v438_v43  ;;  %vm533_vm12 = vcmask 1041409  }
 0x1ec   : > { %v480_v56 = vsel %vm479_vm15, %v476_v44, %v437_v55  ;;  %v482_v63 = vsel %vm481_vm1, %v478_v62, %v438_v43  ;;  %v238_v45 = vpop.permute.xlu1 %237  ;;  %v371_v44 = vmax.f32 %v334_v60, %v336_v52 }
 0x1ed   : > { %602 = vadd.xlane.f32.xlu2 %v601_v49  ;;  %vm483_vm4 = vcmp.lt.s32.totalorder %v480_v56, %v482_v63  ;;  %v335_v0 = vadd.f32 %v238_v45, %v1812_v30 }
 0x1ee   : > { %v1567_v20 = vsel %vm483_vm4, %v480_v56, %v482_v63  ;;  %v1599_v56 = vadd.f32 %v1456_v54, %v1129_v36 }
 0x1ef   : > { %v370_v51 = vmax.f32 %v333_v1, %v335_v0 }
 0x1f1   : > { %v256_v50 = vpop.permute.xlu2 %255 }
 0x1f2   : > { %v1591_v49 = vadd.f32 %v256_v50, %v1114_v33 }
 0x1f7   : > { %v250_v22 = vpop.permute.xlu1 %249 }
 0x1f8   : > { %v1583_v2 = vadd.f32 %v250_v22, %v1109_v32 }
 0x1f9   : > { %v268_v48 = vpop.permute.xlu2 %267 }
 0x1fa   : > { %v372_v43 = vmax.f32 %v370_v51, %v1583_v2  ;;  %v1595_v62 = vadd.f32 %v268_v48, %v1124_v35  ;;  %v1844_v51 = vld [vmem:[#allocation10_spill] sm:$0xff] }
 0x1ff   : > { %606 = vadd.xlane.f32.xlu1 %v605_v26  ;;  %v373_v26 = vmax.f32 %v371_v44, %v1591_v49  ;;  %v1845_v44 = vld [vmem:[#allocation11_spill] sm:$0xff] }
 0x201   : > { %v286_v58 = vpop.permute.xlu2 %285  ;;  %v375_v22 = vmax.f32 %v373_v26, %v1595_v62 }
 0x202   : > { %v1608_v50 = vadd.f32 %v286_v58, %v1139_v38 }
 0x207   : > { %v262_v47 = vpop.permute.xlu1 %261 }
 0x208   : > { %v1588_v41 = vadd.f32 %v262_v47, %v1119_v34 }
 0x20a   : > { %v374_v63 = vmax.f32 %v372_v43, %v1588_v41 }
 0x20c   : > { %v376_v47 = vmax.f32 %v374_v63, %v1599_v56  ;;  %v1846_v63 = vld [vmem:[#allocation12_spill] sm:$0xff] }
 0x20e   : > { %v298_v55 = vpop.permute.xlu2 %297  ;;  %v378_v26 = vmax.f32 %v376_v47, %v1608_v50 }
 0x20f   : > { %v1616_v43 = vadd.f32 %v298_v55, %v1844_v51  ;;  %v1849_v51 = vld [vmem:[#allocation13_spill] sm:$0xff] }
 0x211   : > { %v380_v55 = vmax.f32 %v378_v26, %v1616_v43  ;;  %v538_v26 = vrot.slane %v1573_v23, 1 }
 0x217   : > { %v280_v57 = vpop.permute.xlu1 %279 }
 0x218   : > { %v1604_v24 = vadd.f32 %v280_v57, %v1134_v37 }
 0x21a   : > { %v377_v57 = vmax.f32 %v375_v22, %v1604_v24 }
 0x21d   : > { %v577_v59 = vpop.permute.xlu0 %576 }
 0x21e   : > { %vm578_vm6 = vcmp.eq.s32.totalorder %v577_v59, 1 }
 0x227   : > { %v292_v46 = vpop.permute.xlu1 %291 }
 0x228   : > { %v1612_v54 = vadd.f32 %v292_v46, %v1144_v39 }
 0x22a   : > { %v379_v46 = vmax.f32 %v377_v57, %v1612_v54 }
 0x235   : > { %v566_v61 = vpop.f32.mrf.mxu0 }
 0x236   : > { %892 = vlog2.f32 %v566_v61  ;;  %v310_v61 = vpop.permute.xlu2 %309 }
 0x237   : > { %v304_v27 = vpop.permute.xlu1 %303  ;;  %v1625_v28 = vadd.f32 %v310_v61, %v1846_v63 }
 0x23c   : > { %v893_v53 = vpop.eup %892 }
 0x23d   : > { %v570_v45 = vmul.f32 0.6931472, %v893_v53  ;;  %v1620_v53 = vadd.f32 %v304_v27, %v1845_v44 }
 0x23f   : > { %v571_v48 = vadd.f32 %v570_v45, %v1442_v19  ;;  %v1847_v19 = vld [vmem:[#allocation32_spill] sm:$0xff]  ;;  %v381_v22 = vmax.f32 %v379_v46, %v1620_v53 }
 0x241   : > { %v572_v58 = vadd.f32 %v571_v48, %v1573_v23  ;;  %v382_v48 = vmax.f32 %v380_v55, %v1625_v28 }
 0x243   : > { %v1629_v63 = vsel %vm578_vm6, %v572_v58, %v1847_v19  }
 0x244   : > { %v1848_v45 = vmov %v1629_v63  ;;  %v485_v63 = vrot.slane %v1567_v20, 4 }
 0x246   : > { %vm486_vm9 = vcmp.lt.s32.totalorder %v1567_v20, %v485_v63 }
 0x247   : > { %v316_v59 = vpop.permute.xlu1 %315 }
 0x248   : > { %v1634_v27 = vadd.f32 %v316_v59, %v1849_v51 }
 0x24a   : > { %v383_v47 = vmax.f32 %v381_v22, %v1634_v27 }
 0x24c   : > { %v384_v44 = vmax.f32 %v382_v48, %v383_v47 }
 0x24e   : > { %v385_v61 = vrot.slane %v384_v44, 4 }
 0x250   : > { %v386_v29 = vmax.f32 %v384_v44, %v385_v61 }
 0x252   : > { %v387_v30 = vrot.slane %v386_v29, 2 }
 0x254   : > { %v388_v57 = vmax.f32 %v386_v29, %v387_v30 }
 0x256   : > { %v389_v31 = vrot.slane %v388_v57, 1 }
 0x258   : > { %v1638_v58 = vmax.f32 %v388_v57, %v389_v31 }
 0x25a   : > { %vm407_vm7 = vcmp.eq.f32.partialorder %v333_v1, %v1638_v58  ;;  %vm408_vm0 = vcmp.eq.f32.partialorder %v334_v60, %v1638_v58  ;;  %vm409_vm3 = vcmp.eq.f32.partialorder %v335_v0, %v1638_v58  ;;  %vm410_vm8 = vcmp.eq.f32.partialorder %v336_v52, %v1638_v58 }
 0x25b   : > { %v439_v46 = vsel %vm407_vm7, %v1029_v3, 128  ;;  %v440_v29 = vsel %vm408_vm0, %v1032_v4, 128  ;;  %v441_v30 = vsel %vm409_vm3, %v1035_v5, 128  ;;  %v442_v31 = vsel %vm410_vm8, %v1038_v6, 128 }
 0x25c   : > { %v1652_v1 = vsel %vm486_vm9, %v1567_v20, %v485_v63  ;;  %v541_v0 = vadd.f32 %v1485_v40, %v1573_v23  ;;  %vm411_vm10 = vcmp.eq.f32.partialorder %v1583_v2, %v1638_v58  ;;  %vm412_vm11 = vcmp.eq.f32.partialorder %v1591_v49, %v1638_v58 }
 0x25d   : > { %vm413_vm13 = vcmp.eq.f32.partialorder %v1588_v41, %v1638_v58  ;;  %vm414_vm14 = vcmp.eq.f32.partialorder %v1595_v62, %v1638_v58  ;;  %vm415_vm15 = vcmp.eq.f32.partialorder %v1599_v56, %v1638_v58  ;;  %vm416_vm1 = vcmp.eq.f32.partialorder %v1604_v24, %v1638_v58 }
 0x25e   : > { %vm494_vm4 = vcmp.lt.s32.totalorder %v439_v46, %v441_v30  ;;  %vm496_vm2 = vcmp.lt.s32.totalorder %v440_v29, %v442_v31  ;;  %v542_v40 = vadd.f32 %v538_v26, %v1638_v58  ;;  %v443_v20 = vsel %vm411_vm10, %v1041_v7, 128 }
 0x25f   : > { %v444_v23 = vsel %vm412_vm11, %v1044_v8, 128  ;;  %v495_v2 = vsel %vm494_vm4, %v439_v46, %v441_v30  ;;  %v497_v60 = vsel %vm496_vm2, %v440_v29, %v442_v31  ;;  %vm417_vm5 = vcmp.eq.f32.partialorder %v1608_v50, %v1638_v58 }
 0x260   : > { %vm498_vm6 = vcmp.lt.s32.totalorder %v495_v2, %v443_v20  ;;  %vm500_vm7 = vcmp.lt.s32.totalorder %v497_v60, %v444_v23  ;;  %v627_v52 = vrot.slane %v542_v40, 7  ;;  %v445_v41 = vsel %vm413_vm13, %v1047_v9, 128  ;;  %v603_v30 = vpop.xlane.xlu2 %602 }
 0x261   : > { %v446_v49 = vsel %vm414_vm14, %v1050_v10, 128  ;;  %v499_v62 = vsel %vm498_vm6, %v495_v2, %v443_v20  ;;  %v501_v19 = vsel %vm500_vm7, %v497_v60, %v444_v23  ;;  %vm418_vm0 = vcmp.eq.f32.partialorder %v1612_v54, %v1638_v58  ;;  %v1851_v23 = vld [vmem:[#allocation33_spill] sm:$0xff] }
 0x262   : > { %vm502_vm3 = vcmp.lt.s32.totalorder %v499_v62, %v445_v41  ;;  %vm504_vm8 = vcmp.lt.s32.totalorder %v501_v19, %v446_v49  ;;  %v1678_v22 = vsel %vm533_vm12, %v627_v52, %v541_v0   ;;  %v447_v55 = vsel %vm415_vm15, %v1053_v11, 128 }
 0x263   : > { %v1850_v59 = vmov %v1678_v22  ;;  %v448_v51 = vsel %vm416_vm1, %v1056_v12, 128  ;;  %v503_v48 = vsel %vm502_vm3, %v499_v62, %v445_v41  ;;  %v505_v47 = vsel %vm504_vm8, %v501_v19, %v446_v49  ;;  %v1852_v41 = vld [vmem:[#allocation31_spill] sm:$0xff] }
 0x264   : > { %vm419_vm9 = vcmp.eq.f32.partialorder %v1616_v43, %v1638_v58  ;;  %vm420_vm10 = vcmp.eq.f32.partialorder %v1620_v53, %v1638_v58  ;;  %vm506_vm11 = vcmp.lt.s32.totalorder %v503_v48, %v447_v55  ;;  %vm508_vm13 = vcmp.lt.s32.totalorder %v505_v47, %v448_v51 }
 0x265   : > { %v449_v56 = vsel %vm417_vm5, %v1059_v13, 128  ;;  %v450_v54 = vsel %vm418_vm0, %v1062_v14, 128  ;;  %v507_v22 = vsel %vm506_vm11, %v503_v48, %v447_v55  ;;  %v509_v24 = vsel %vm508_vm13, %v505_v47, %v448_v51  ;;  %v1858_v48 = vld [vmem:[#allocation30_spill] sm:$0xff] (%p101_p0) }
 0x266   : > { %vm421_vm14 = vcmp.eq.f32.partialorder %v1625_v28, %v1638_v58  ;;  %vm422_vm15 = vcmp.eq.f32.partialorder %v1634_v27, %v1638_v58  ;;  %vm510_vm1 = vcmp.lt.s32.totalorder %v507_v22, %v449_v56  ;;  %vm512_vm4 = vcmp.lt.s32.totalorder %v509_v24, %v450_v54 }
 0x267   : > { %v451_v43 = vsel %vm419_vm9, %v1065_v15, 128  ;;  %v452_v53 = vsel %vm420_vm10, %v1068_v16, 128  ;;  %v511_v44 = vsel %vm510_vm1, %v507_v22, %v449_v56  ;;  %v513_v61 = vsel %vm512_vm4, %v509_v24, %v450_v54 }
 0x268   : > { %v488_v50 = vrot.slane %v1652_v1, 2  ;;  %vm514_vm2 = vcmp.lt.s32.totalorder %v511_v44, %v451_v43  ;;  %vm516_vm5 = vcmp.lt.s32.totalorder %v513_v61, %v452_v53  ;;  %v453_v57 = vsel %vm421_vm14, %v1071_v17, 128 }
 0x269   : > { %v454_v63 = vsel %vm422_vm15, %v1074_v18, 128  ;;  %v515_v28 = vsel %vm514_vm2, %v511_v44, %v451_v43  ;;  %v517_v26 = vsel %vm516_vm5, %v513_v61, %v452_v53  ;;  %v1857_v22 = vmov %v1850_v59 }
 0x26a   : > { %vm518_vm6 = vcmp.lt.s32.totalorder %v515_v28, %v453_v57  ;;  %vm520_vm7 = vcmp.lt.s32.totalorder %v517_v26, %v454_v63  ;;  %vm489_vm0 = vcmp.lt.s32.totalorder %v1652_v1, %v488_v50  ;;  %v631_v47 = vperm.slane (%p101_p0), %v1858_v48, 0 }
 0x26b   : > { %v519_v27 = vsel %vm518_vm6, %v515_v28, %v453_v57  ;;  %v521_v58 = vsel %vm520_vm7, %v517_v26, %v454_v63  ;;  %v490_v0 = vsel %vm489_vm0, %v1652_v1, %v488_v50  ;;  %v1856_v63 = vmov %v1848_v45 }
 0x26c   : > { %vm522_vm3 = vcmp.lt.s32.totalorder %v519_v27, %v521_v58  ;;  %v491_v60 = vrot.slane %v490_v0, 1  ;;  %v633_v56 = vadd.f32 (%p101_p0), %v631_v47, %v1850_v59  ;;  %vm655_vm1 = vcmask (%p101_p0), 1024  }
 0x26d   : > { %v523_v46 = vsel %vm522_vm3, %v519_v27, %v521_v58 }
 0x26e   : > { %v524_v29 = vrot.slane %v523_v46, 4  ;;  %vm492_vm10 = vcmp.lt.s32.totalorder %v490_v0, %v491_v60 }
 0x26f   : > { %v493_v55 = vsel %vm492_vm10, %v490_v0, %v491_v60 }
 0x270   : > { %vm525_vm8 = vcmp.lt.s32.totalorder %v523_v46, %v524_v29 }
 0x271   : > { %v526_v20 = vsel %vm525_vm8, %v523_v46, %v524_v29 }
 0x272   : > { %v607_v31 = vpop.xlane.xlu1 %606  ;;  %v527_v52 = vrot.slane %v526_v20, 2 }
 0x273   : > { %v608_v40 = vadd.f32 %v607_v31, %v603_v30 }
 0x274   : > { %vm528_vm9 = vcmp.lt.s32.totalorder %v526_v20, %v527_v52 }
 0x275   : > { %v609_v2 = vmul.f32 %v608_v40, %v1851_v23  ;;  %v529_v62 = vsel %vm528_vm9, %v526_v20, %v527_v52 }
 0x276   : > { %v530_v19 = vrot.slane %v529_v62, 1 }
 0x277   : > { %v1710_v61 = vadd.f32 %v1852_v41, %v609_v2   ;;  %103 = sbr.rel (!%p101_p0) target bundleno = 236 (0xec), region = 78 }
 0x278   : > { %vm531_vm11 = vcmp.lt.s32.totalorder %v529_v62, %v530_v19 }
 0x279   : > { %v1853_v49 = vmov %v1710_v61  ;;  %v532_v51 = vsel %vm531_vm11, %v529_v62, %v530_v19  ;;  %v1854_v62 = vmov %v1840_v42 }
 0x27a   : > { %v534_v1 = vsel %vm533_vm12, %v532_v51, %v493_v55  ;;  %v1855_v61 = vmov %v1853_v49  ;;  %vm1859_vm12 = vcmask (%p101_p0), 1041408  }
 0x27b   : > { %536 = vst [vmem:[%s535_s14] sm:$0x3] %v534_v1  ;;  %v634_v54 = vsel (%p101_p0), %vm1859_vm12, %v633_v56, -inf  ;;  %vm1860_vm14 = vmmov (%p101_p0), %vm1859_vm12 }
 0x27c   :  { %635 = vmax.xlane.f32.xlu0 %v634_v54 }
 0x2ef   :  { %v636_v22 = vpop.xlane.xlu0 %635 }
 0x2f0   :  { %vm637_vm13 = vcmp.eq.f32.partialorder %v633_v56, %v636_v22 }
 0x2f1   :  { %v638_v24 = vsel %vm637_vm13, %v1082_v21, 128 }
 0x2f2   :  { %v639_v43 = vsel %vm1860_vm14, %v638_v24, 2147483647 }
 0x2f3   :  { %v641_v53 = vshra.s32 %v639_v43, 16  ;;  %v640_v50 = vand.u32 65535, %v639_v43 }
 0x2f5   :  { %v643_v44 = vcvt.s32.f32 %v641_v53  ;;  %v642_v28 = vcvt.s32.f32 %v640_v50 }
 0x2f7   :  { %644 = vmin.xlane.f32.xlu0 %v643_v44 }
 0x36a   :  { %v645_v57 = vpop.xlane.xlu0 %644 }
 0x36b   :  { %vm646_vm15 = vcmp.eq.f32.partialorder %v643_v44, %v645_v57  ;;  %v651_v4 = vcvt.f32.s32 %v645_v57 }
 0x36c   :  { %v647_v3 = vsel %vm646_vm15, %v642_v28, inf }
 0x36d   :  { %648 = vmin.xlane.f32.xlu1 %v647_v3  ;;  %v652_v6 = vshll.u32 %v651_v4, 16 }
 0x3e0   :  { %v649_v5 = vpop.xlane.xlu1 %648 }
 0x3e1   :  { %v650_v7 = vcvt.f32.s32 %v649_v5 }
 0x3e3   :  { %v653_v8 = vadd.s32 %v652_v6, %v650_v7  }
 0x3e5   :  { %780 = vst.msk [vmem:[%s1769_s7 + $0xe] sm:$0x3] %vm655_vm1, %v653_v8  ;;  %v968_v9 = vmov %v653_v8  }
 0x3e6 LB: > { %s665_s15 = ssub.s32 7, %s974_s2  ;;  %vm669_vm4 = vcmp.eq.s32.totalorder %v1082_v21, %v970_v9  ;;  %vm1861_vm2 = vcmask 1041408   ;;  %s664_s18 = ssub.s32 6, %s974_s2  ;;  %s974_s2 = sphi %s1741_s2, %s662_s2   ;;  %v970_v9 = vphi %v968_v9, %v683_v9  }
 0x3e7   : > { %s781_s16 = sshll.u32 %s665_s15, 1  ;;  %s782_s19 = sshll.u32 %s664_s18, 1 }
 0x3e8   : > { %s667_s17 = scalar_lea.vmem [#allocation2], %s781_s16  ;;  %s685_s22 = scalar_lea.vmem %s1769_s7, %s782_s19 }
 0x3e9   : > { %v668_v10 = vld [vmem:[%s667_s17] sm:$0x3]  ;;  %s662_s2 = sadd.s32 1, %s974_s2  }
 0x3ea   : > { %v670_v11 = vsel %vm669_vm4, %v668_v10, 0  ;;  %p659_p1 = scmp.ge.s32.totalorder %s662_s2, 7  }
 0x3eb   : > { %v671_v12 = vsel %vm1861_vm2, %v670_v11, 0  ;;  %v692_v35 = vadd.f32 (%p659_p1), %v631_v47, %v1848_v45  ;;  %vm1862_vm5 = vcmask (%p659_p1), 1041408   ;;  %v687_v37 = vmul.f32 (%p659_p1), %v631_v47, %v1840_v42  ;;  %s725_s24 = sshll.u32 (%p659_p1), %s1770_s8, 4  ;;  %s980_s26 = smov (%p659_p1), [#allocation3]   ;;  %s726_s24 = int_to_ptr.hbm [resolvable:$true] %s725_s24 }
 0x3ec   : > { %v673_v13 = vshrl.u32 %v671_v12, 16  ;;  %v672_v15 = vand.u32 65535, %v671_v12  ;;  %vm1863_vm6 = vmmov (%p659_p1), %vm1862_vm5 }
 0x3ed   :  { %v693_v36 = vsel (%p659_p1), %vm1862_vm5, %v692_v35, -inf  ;;  %v688_v38 = vsel (%p659_p1), %vm1863_vm6, %v687_v37, 0.0  ;;  %vm1864_vm7 = vmmov (%p659_p1), %vm1862_vm5 }
 0x3ee   : > { %v675_v14 = vcvt.s32.f32 %v673_v13  ;;  %v674_v16 = vcvt.s32.f32 %v672_v15  ;;  %689 = vadd.xlane.f32.xlu1 (%p659_p1), %v688_v38 }
 0x3f0   : > { %678 = vadd.xlane.f32.xlu0 %v675_v14 }
 0x3f8   : > { %676 = vadd.xlane.f32.xlu0 %v674_v16 }
 0x400   :  { %694 = vmax.xlane.f32.xlu0 (%p659_p1), %v693_v36 }
 0x461   :  { %v690_v21 = vpop.xlane.xlu1 (%p659_p1), %689 }
 0x462   :  { %v691_v58 = vadd.f32 (%p659_p1), %v690_v21, %v1853_v49 }
 0x463   : > { %v679_v17 = vpop.xlane.xlu0 %678 }
 0x464   : > { %v681_v18 = vcvt.f32.s32 %v679_v17 }
 0x466   : > { %v682_v33 = vshll.u32 %v681_v18, 16 }
 0x46b   : > { %v677_v32 = vpop.xlane.xlu0 %676 }
 0x46c   : > { %v680_v34 = vcvt.f32.s32 %v677_v32  ;;  %661 = sbr.rel (!%p659_p1) target bundleno = 998 (0x3e6), region = 89 }
 0x46e   : > { %v683_v9 = vadd.s32 %v682_v33, %v680_v34  }
 0x470   : > { %686 = vst.msk [vmem:[%s685_s22] sm:$0x3] %vm655_vm1, %v683_v9 }
 0x473   :  { %v695_v39 = vpop.xlane.xlu0 %694 }
 0x474   :  { %v696_v25 = vsub.f32 %v692_v35, %v695_v39 }
 0x476   :  { %v697_v59 = vmul.f32 1.442695, %v696_v25 }
 0x478   :  { %894 = vpow2.f32 %v697_v59 }
 0x47e   :  { %v895_v61 = vpop.eup %894 }
 0x47f   :  { %v699_v63 = vsel %vm1864_vm7, %v895_v61, 0.0 }
 0x480   :  { %700 = vadd.xlane.f32.xlu0 %v699_v63 }
 0x4f3   :  { %v701_v26 = vpop.xlane.xlu0 %700 }
 0x4f4   :  { %896 = vlog2.f32 %v701_v26 }
 0x4fa   :  { %v897_v45 = vpop.eup %896 }
 0x4fb   :  { %v703_v27 = vmul.f32 0.6931472, %v897_v45 }
 0x4fd   :  { %v704_v46 = vadd.f32 %v703_v27, %v695_v39 }
 0x4ff   :  { %v705_v42 = vsub.f32 %v691_v58, %v704_v46 }
 0x501   :  { %v706_v29 = vsel %vm655_vm1, %v705_v42, 0.0 }
 0x502   :  { %707 = vadd.xlane.f32.xlu1 %v706_v29 }
 0x575   :  { %v708_v30 = vpop.xlane.xlu1 %707 }
 0x576   :  { %v709_v31 = vrot.slane %v708_v30, 4 }
 0x578   :  { %v710_v0 = vadd.f32 %v709_v31, %v708_v30 }
 0x57a   :  { %v711_v40 = vrot.slane %v710_v0, 2 }
 0x57c   :  { %v712_v20 = vadd.f32 %v711_v40, %v710_v0 }
 0x57e   :  { %v713_v23 = vrot.slane %v712_v20, 1 }
 0x580   :  { %v714_v2 = vadd.f32 %v713_v23, %v712_v20 }
 0x582   :  { %783 = vpush %v714_v2 }
 0x5b3   :  { %s784_s25 = spop %783 }
 0x5b4   :  { %717 = sst [smem:[#allocation3]] %s784_s25 }
 0x5b5   :  { %728 = dma.smem_to_hbm %s980_s26, 16, %s726_s24, [#allocation4]  }
 0x5b6   :  { %942 = dma.done.wait [#allocation4], 16  }
 0x5b7   :  { %943 = vsyncadd [#allocation4], 4294967280 }
 0x5b8   :  { %735 = sfence }
 0x5b9   :  { %736 = vsyncpa [#allocation4], 1 }

</bundles_post_ra>
